<compile_context>
chip_gen: v5e
topology: v5e:2x2
jax: 0.10.0
libtpu: 0.0.40
codegen_flags: <defaults>
</compile_context>

<pallas_src>
import jax
import jax.numpy as jnp
from jax import lax
from jax.experimental import pallas as pl
from jax.experimental.pallas import tpu as pltpu


def bilstm_classify_kernel(
    x_ref,       # (T, B, H)    bf16  time-major embedded inputs
    wih_f_ref,   # (H, 4H)      bf16  forward  W_ih^T
    wih_b_ref,   # (H, 4H)      bf16  backward W_ih^T
    b_f_ref,     # (1, 4H)      f32   b_ih_f + b_hh_f
    b_b_ref,     # (1, 4H)      f32   b_ih_b + b_hh_b
    whh_bd_ref,  # (2H, 8H)     bf16  block-diag [W_hh_f^T | W_hh_b^T]
    wc_f_ref,    # (H, Cpad)    bf16  classifier rows for fwd hidden (lane padded)
    wc_b_ref,    # (H, Cpad)    bf16  classifier rows for bwd hidden (lane padded)
    bc_ref,      # (1, Cpad)    f32   classifier bias (lane padded)
    out_ref,     # (T, B, C)    f32   compact logits, time-major
    gin_f_scr,   # (T, B, 4H)   bf16  precomputed input-side gates, forward
    gin_b_scr,   # (T, B, 4H)   bf16  precomputed input-side gates, backward
    acc_scr,     # (T, B, Cpad) f32   lane-dense logit accumulator
):
    T, B, H = x_ref.shape
    H4 = 4 * H
    C = out_ref.shape[-1]

    # ---- Hoisted input projection: one bf16 MXU pass per direction ----
    x2 = x_ref[...].reshape(T * B, H)
    gf = jnp.dot(x2, wih_f_ref[...], preferred_element_type=jnp.float32) + b_f_ref[...]
    gb = jnp.dot(x2, wih_b_ref[...], preferred_element_type=jnp.float32) + b_b_ref[...]
    gin_f_scr[...] = gf.reshape(T, B, H4).astype(gin_f_scr.dtype)
    gin_b_scr[...] = gb.reshape(T, B, H4).astype(gin_b_scr.dtype)

    # Lane-dense logit accumulator initialized with the classifier bias.
    acc_scr[...] = jnp.broadcast_to(bc_ref[...], acc_scr.shape)

    # Hoisted, loop-invariant gate-lane mask: lanes [2H,3H) are the 'g' gate (tanh).
    lane = lax.broadcasted_iota(jnp.int32, (B, H4), 1)
    is_g = (lane >= 2 * H) & (lane < 3 * H)
    scale = jnp.where(is_g, jnp.float32(1.0), jnp.float32(0.5))

    def activate(gates, c_prev):
        # Single transcendental pass: sigmoid(x) = 0.5 * (1 + tanh(x / 2)).
        t = jnp.tanh(gates * scale)
        act = jnp.where(is_g, t, 0.5 * (t + 1.0))
        i = act[:, 0 * H:1 * H]
        f = act[:, 1 * H:2 * H]
        g = act[:, 2 * H:3 * H]
        o = act[:, 3 * H:4 * H]
        c = f * c_prev + i * g
        h = o * jnp.tanh(c)
        return h, c

    # ---- Fused fwd+bwd recurrence; classifier accumulated in-loop ----
    def step(s, carry):
        h_cat, c_f, c_b = carry
        t = s
        tb = T - 1 - s

        # One MXU push for both directions via the block-diagonal W_hh.
        g_hh = jnp.dot(h_cat.astype(whh_bd_ref.dtype), whh_bd_ref[...],
                       preferred_element_type=jnp.float32)          # (B, 8H)

        gates_f = gin_f_scr[t].astype(jnp.float32) + g_hh[:, :H4]
        gates_b = gin_b_scr[tb].astype(jnp.float32) + g_hh[:, H4:]

        h_f, c_f = activate(gates_f, c_f)
        h_b, c_b = activate(gates_b, c_b)

        # Classifier folded into the loop: unmasked 128-lane VMEM accumulates.
        acc_scr[t] = acc_scr[t] + jnp.dot(
            h_f.astype(wc_f_ref.dtype), wc_f_ref[...],
            preferred_element_type=jnp.float32)
        acc_scr[tb] = acc_scr[tb] + jnp.dot(
            h_b.astype(wc_b_ref.dtype), wc_b_ref[...],
            preferred_element_type=jnp.float32)

        h_cat = jnp.concatenate([h_f, h_b], axis=-1)                 # (B, 2H)
        return (h_cat, c_f, c_b)

    h0 = jnp.zeros((B, 2 * H), jnp.float32)
    c0 = jnp.zeros((B, H), jnp.float32)
    lax.fori_loop(0, T, step, (h0, c0, c0), unroll=True)

    # Compact HBM output; lane padding stays in VMEM only.
    out_ref[...] = acc_scr[:, :, :C]


def torch_model_forward(x_ids, params):
    """Inference forward pass (target=None, use_crf=False): returns logits (B, T, C)."""
    emb = params['embedding']                      # (V+1, H), row 0 == 0 (padding_idx)
    ids_tm = x_ids.T                               # (T, B) — transpose tiny int ids only
    x_tm = jnp.take(emb, ids_tm, axis=0).astype(jnp.bfloat16)   # (T, B, H) time-major

    T, B = ids_tm.shape
    H = emb.shape[1]
    H4 = 4 * H
    C = params['wc'].shape[1]
    Cpad = ((C + 127) // 128) * 128

    f32, bf16 = jnp.float32, jnp.bfloat16

    # One-time weight packing (outside the kernel).
    wih_f = params['wih_f'].astype(bf16)           # (H, 4H)
    wih_b = params['wih_b'].astype(bf16)
    b_f = params['b_f'].astype(f32)                # (1, 4H)
    b_b = params['b_b'].astype(f32)

    whh_bd = jnp.zeros((2 * H, 2 * H4), f32)       # block-diag [W_hh_f^T | W_hh_b^T]
    whh_bd = whh_bd.at[:H, :H4].set(params['whh_f'])
    whh_bd = whh_bd.at[H:, H4:].set(params['whh_b'])
    whh_bd = whh_bd.astype(bf16)

    wc_f = jnp.zeros((H, Cpad), f32).at[:, :C].set(params['wc'][:H]).astype(bf16)
    wc_b = jnp.zeros((H, Cpad), f32).at[:, :C].set(params['wc'][H:]).astype(bf16)
    bc = jnp.zeros((1, Cpad), f32).at[:, :C].set(params['bc'])

    vmem = pl.BlockSpec(memory_space=pltpu.MemorySpace.VMEM)
    out_tm = pl.pallas_call(
        bilstm_classify_kernel,
        out_shape=jax.ShapeDtypeStruct((T, B, C), f32),
        in_specs=[vmem] * 9,
        out_specs=vmem,
        scratch_shapes=[
            pltpu.VMEM((T, B, H4), bf16),          # input gates, forward
            pltpu.VMEM((T, B, H4), bf16),          # input gates, backward
            pltpu.VMEM((T, B, Cpad), f32),         # lane-dense logit accumulator
        ],
    )(x_tm, wih_f, wih_b, b_f, b_b, whh_bd, wc_f, wc_b, bc)

    # Transpose only the tiny (T, B, C) logits back to batch-first.
    return jnp.transpose(out_tm, (1, 0, 2))        # (B, T, C)


def init_params(key, vocab_size, hidden_size, class_num):
    """Deterministic synthetic parameters matching the nn.Module shapes."""
    H = hidden_size
    V1 = vocab_size + 1
    ks = jax.random.split(key, 12)
    s = 1.0 / jnp.sqrt(jnp.float32(H))

    emb = jax.random.normal(ks[0], (V1, H), jnp.float32) * 0.1
    emb = emb.at[0].set(0.0)  # padding_idx=0

    def u(k, shape):
        return jax.random.uniform(k, shape, jnp.float32, -s, s)

    # PyTorch LSTM stores W_ih (4H, H) with gate order i|f|g|o; kept transposed (H, 4H).
    wih_f = u(ks[1], (H, 4 * H))
    whh_f = u(ks[2], (H, 4 * H))
    b_f = (u(ks[3], (1, 4 * H)) + u(ks[4], (1, 4 * H)))   # b_ih + b_hh
    wih_b = u(ks[5], (H, 4 * H))
    whh_b = u(ks[6], (H, 4 * H))
    b_b = (u(ks[7], (1, 4 * H)) + u(ks[8], (1, 4 * H)))

    sc = 1.0 / jnp.sqrt(jnp.float32(2 * H))
    wc = jax.random.uniform(ks[9], (2 * H, class_num), jnp.float32, -sc, sc)
    bc = jax.random.uniform(ks[10], (1, class_num), jnp.float32, -sc, sc)

    return dict(embedding=emb, wih_f=wih_f, whh_f=whh_f, b_f=b_f,
                wih_b=wih_b, whh_b=whh_b, b_b=b_b, wc=wc, bc=bc)


if __name__ == "__main__":
    config = dict(hidden_size=32, vocab_size=30, class_num=4, use_crf=False)
    B, T = 2, 8

    key = jax.random.PRNGKey(0)
    pkey, xkey = jax.random.split(key)
    params = init_params(pkey, config['vocab_size'], config['hidden_size'],
                         config['class_num'])

    x_ids = jax.random.randint(xkey, (B, T), 0, config['vocab_size'] + 1,
                               dtype=jnp.int32)

    logits = torch_model_forward(x_ids, params)
    jax.block_until_ready(logits)
    assert logits.shape == (B, T, config['class_num'])
    assert bool(jnp.all(jnp.isfinite(logits)))
    print("KERNEL_OK")
</pallas_src>

<mosaic_0001>
module attributes {stable_mosaic.version = 11 : i64} {
  func.func @bilstm_classify_kernel(%arg0: memref<8x2x32xbf16, #tpu.memory_space<vmem>>, %arg1: memref<32x128xbf16, #tpu.memory_space<vmem>>, %arg2: memref<32x128xbf16, #tpu.memory_space<vmem>>, %arg3: memref<1x128xf32, #tpu.memory_space<vmem>>, %arg4: memref<1x128xf32, #tpu.memory_space<vmem>>, %arg5: memref<64x256xbf16, #tpu.memory_space<vmem>>, %arg6: memref<32x128xbf16, #tpu.memory_space<vmem>>, %arg7: memref<32x128xbf16, #tpu.memory_space<vmem>>, %arg8: memref<1x128xf32, #tpu.memory_space<vmem>>, %arg9: memref<8x2x4xf32, #tpu.memory_space<vmem>>, %arg10: memref<8x2x128xbf16, #tpu.memory_space<vmem>>, %arg11: memref<8x2x128xbf16, #tpu.memory_space<vmem>>, %arg12: memref<8x2x128xf32, #tpu.memory_space<vmem>>) attributes {dimension_semantics = [], scalar_prefetch = 0 : i64, scratch_operands = 3 : i64, tpu.core_type = #tpu.core_type<tc>} {
    %c0 = arith.constant 0 : index
    %c0_0 = arith.constant 0 : index
    %c0_1 = arith.constant 0 : index
    %0 = vector.load %arg0[%c0, %c0_0, %c0_1] : memref<8x2x32xbf16, #tpu.memory_space<vmem>>, vector<8x2x32xbf16>
    %1 = vector.shape_cast %0 : vector<8x2x32xbf16> to vector<16x32xbf16>
    %c0_2 = arith.constant 0 : index
    %c0_3 = arith.constant 0 : index
    %2 = vector.load %arg1[%c0_2, %c0_3] : memref<32x128xbf16, #tpu.memory_space<vmem>>, vector<32x128xbf16>
    %cst = arith.constant dense<0.000000e+00> : vector<16x128xf32>
    %3 = tpu.matmul %1, %2, %cst {dimension_numbers = #tpu.dot_dimension_numbers<[1], [0], [0], [1], [0, 0, 1, 1], [], []>} : vector<16x32xbf16>, vector<32x128xbf16>, vector<16x128xf32> -> vector<16x128xf32>
    %c0_4 = arith.constant 0 : index
    %c0_5 = arith.constant 0 : index
    %4 = vector.load %arg3[%c0_4, %c0_5] : memref<1x128xf32, #tpu.memory_space<vmem>>, vector<1x128xf32>
    %5 = vector.broadcast %4 : vector<1x128xf32> to vector<16x128xf32>
    %6 = arith.addf %3, %5 : vector<16x128xf32>
    %c0_6 = arith.constant 0 : index
    %c0_7 = arith.constant 0 : index
    %7 = vector.load %arg2[%c0_6, %c0_7] : memref<32x128xbf16, #tpu.memory_space<vmem>>, vector<32x128xbf16>
    %cst_8 = arith.constant dense<0.000000e+00> : vector<16x128xf32>
    %8 = tpu.matmul %1, %7, %cst_8 {dimension_numbers = #tpu.dot_dimension_numbers<[1], [0], [0], [1], [0, 0, 1, 1], [], []>} : vector<16x32xbf16>, vector<32x128xbf16>, vector<16x128xf32> -> vector<16x128xf32>
    %c0_9 = arith.constant 0 : index
    %c0_10 = arith.constant 0 : index
    %9 = vector.load %arg4[%c0_9, %c0_10] : memref<1x128xf32, #tpu.memory_space<vmem>>, vector<1x128xf32>
    %10 = vector.broadcast %9 : vector<1x128xf32> to vector<16x128xf32>
    %11 = arith.addf %8, %10 : vector<16x128xf32>
    %12 = vector.shape_cast %6 : vector<16x128xf32> to vector<8x2x128xf32>
    %13 = arith.truncf %12 : vector<8x2x128xf32> to vector<8x2x128xbf16>
    %c0_11 = arith.constant 0 : index
    %c0_12 = arith.constant 0 : index
    %c0_13 = arith.constant 0 : index
    %14 = vector.load %arg10[%c0_11, %c0_12, %c0_13] : memref<8x2x128xbf16, #tpu.memory_space<vmem>>, vector<8x2x128xbf16>
    tpu.vector_store %arg10[%c0_11, %c0_12, %c0_13], %13 {strides = array<i32>} : memref<8x2x128xbf16, #tpu.memory_space<vmem>>, vector<8x2x128xbf16>,
    %15 = vector.shape_cast %11 : vector<16x128xf32> to vector<8x2x128xf32>
    %16 = arith.truncf %15 : vector<8x2x128xf32> to vector<8x2x128xbf16>
    %c0_14 = arith.constant 0 : index
    %c0_15 = arith.constant 0 : index
    %c0_16 = arith.constant 0 : index
    %17 = vector.load %arg11[%c0_14, %c0_15, %c0_16] : memref<8x2x128xbf16, #tpu.memory_space<vmem>>, vector<8x2x128xbf16>
    tpu.vector_store %arg11[%c0_14, %c0_15, %c0_16], %16 {strides = array<i32>} : memref<8x2x128xbf16, #tpu.memory_space<vmem>>, vector<8x2x128xbf16>,
    %c0_17 = arith.constant 0 : index
    %c0_18 = arith.constant 0 : index
    %18 = vector.load %arg8[%c0_17, %c0_18] : memref<1x128xf32, #tpu.memory_space<vmem>>, vector<1x128xf32>
    %19 = vector.shape_cast %18 : vector<1x128xf32> to vector<1x1x128xf32>
    %20 = vector.broadcast %19 : vector<1x1x128xf32> to vector<8x2x128xf32>
    %c0_19 = arith.constant 0 : index
    %c0_20 = arith.constant 0 : index
    %c0_21 = arith.constant 0 : index
    %21 = vector.load %arg12[%c0_19, %c0_20, %c0_21] : memref<8x2x128xf32, #tpu.memory_space<vmem>>, vector<8x2x128xf32>
    tpu.vector_store %arg12[%c0_19, %c0_20, %c0_21], %20 {strides = array<i32>} : memref<8x2x128xf32, #tpu.memory_space<vmem>>, vector<8x2x128xf32>,
    %22 = tpu.iota {dimensions = array<i32: 1>} : vector<2x128xi32>
    %c64_i32 = arith.constant 64 : i32
    %23 = vector.broadcast %c64_i32 : i32 to vector<2x128xi32>
    %24 = arith.cmpi sge, %22, %23 : vector<2x128xi32>
    %c96_i32 = arith.constant 96 : i32
    %25 = vector.broadcast %c96_i32 : i32 to vector<2x128xi32>
    %26 = arith.cmpi slt, %22, %25 : vector<2x128xi32>
    %27 = arith.andi %24, %26 : vector<2x128xi1>
    %cst_22 = arith.constant 1.000000e+00 : f32
    %cst_23 = arith.constant 5.000000e-01 : f32
    %28 = vector.broadcast %cst_22 : f32 to vector<2x128xf32>
    %29 = vector.broadcast %cst_23 : f32 to vector<2x128xf32>
    %30 = arith.select %27, %28, %29 : vector<2x128xi1>, vector<2x128xf32>
    %cst_24 = arith.constant 0.000000e+00 : f32
    %31 = vector.broadcast %cst_24 : f32 to vector<2x64xf32>
    %cst_25 = arith.constant 0.000000e+00 : f32
    %32 = vector.broadcast %cst_25 : f32 to vector<2x32xf32>
    %c0_i32 = arith.constant 0 : i32
    %c7_i32 = arith.constant 7 : i32
    %33 = arith.subi %c7_i32, %c0_i32 : i32
    %34 = arith.truncf %31 : vector<2x64xf32> to vector<2x64xbf16>
    %c0_26 = arith.constant 0 : index
    %c0_27 = arith.constant 0 : index
    %35 = vector.load %arg5[%c0_26, %c0_27] : memref<64x256xbf16, #tpu.memory_space<vmem>>, vector<64x256xbf16>
    %cst_28 = arith.constant dense<0.000000e+00> : vector<2x256xf32>
    %36 = tpu.matmul %34, %35, %cst_28 {dimension_numbers = #tpu.dot_dimension_numbers<[1], [0], [0], [1], [0, 0, 1, 1], [], []>} : vector<2x64xbf16>, vector<64x256xbf16>, vector<2x256xf32> -> vector<2x256xf32>
    %37 = arith.index_cast %c0_i32 : i32 to index
    %c0_29 = arith.constant 0 : index
    %c0_30 = arith.constant 0 : index
    %38 = vector.load %arg10[%37, %c0_29, %c0_30] : memref<8x2x128xbf16, #tpu.memory_space<vmem>>, vector<1x2x128xbf16>
    %39 = vector.shape_cast %38 : vector<1x2x128xbf16> to vector<2x128xbf16>
    %40 = arith.extf %39 : vector<2x128xbf16> to vector<2x128xf32>
    %41 = vector.extract_strided_slice %36 {offsets = [0, 0], sizes = [2, 128], strides = [1, 1]} : vector<2x256xf32> to vector<2x128xf32>
    %42 = arith.addf %40, %41 : vector<2x128xf32>
    %43 = arith.index_cast %33 : i32 to index
    %c0_31 = arith.constant 0 : index
    %c0_32 = arith.constant 0 : index
    %44 = vector.load %arg11[%43, %c0_31, %c0_32] : memref<8x2x128xbf16, #tpu.memory_space<vmem>>, vector<1x2x128xbf16>
    %45 = vector.shape_cast %44 : vector<1x2x128xbf16> to vector<2x128xbf16>
    %46 = arith.extf %45 : vector<2x128xbf16> to vector<2x128xf32>
    %47 = vector.extract_strided_slice %36 {offsets = [0, 128], sizes = [2, 128], strides = [1, 1]} : vector<2x256xf32> to vector<2x128xf32>
    %48 = arith.addf %46, %47 : vector<2x128xf32>
    %49 = arith.mulf %42, %30 : vector<2x128xf32>
    %50 = math.tanh %49 : vector<2x128xf32>
    %cst_33 = arith.constant 1.000000e+00 : f32
    %51 = vector.broadcast %cst_33 : f32 to vector<2x128xf32>
    %52 = arith.addf %50, %51 : vector<2x128xf32>
    %cst_34 = arith.constant 5.000000e-01 : f32
    %53 = vector.broadcast %cst_34 : f32 to vector<2x128xf32>
    %54 = arith.mulf %53, %52 : vector<2x128xf32>
    %55 = arith.select %27, %50, %54 : vector<2x128xi1>, vector<2x128xf32>
    %56 = vector.extract_strided_slice %55 {offsets = [0, 0], sizes = [2, 32], strides = [1, 1]} : vector<2x128xf32> to vector<2x32xf32>
    %57 = vector.extract_strided_slice %55 {offsets = [0, 32], sizes = [2, 32], strides = [1, 1]} : vector<2x128xf32> to vector<2x32xf32>
    %58 = vector.extract_strided_slice %55 {offsets = [0, 64], sizes = [2, 32], strides = [1, 1]} : vector<2x128xf32> to vector<2x32xf32>
    %59 = vector.extract_strided_slice %55 {offsets = [0, 96], sizes = [2, 32], strides = [1, 1]} : vector<2x128xf32> to vector<2x32xf32>
    %60 = arith.mulf %57, %32 : vector<2x32xf32>
    %61 = arith.mulf %56, %58 : vector<2x32xf32>
    %62 = arith.addf %60, %61 : vector<2x32xf32>
    %63 = math.tanh %62 : vector<2x32xf32>
    %64 = arith.mulf %59, %63 : vector<2x32xf32>
    %65 = arith.mulf %48, %30 : vector<2x128xf32>
    %66 = math.tanh %65 : vector<2x128xf32>
    %cst_35 = arith.constant 1.000000e+00 : f32
    %67 = vector.broadcast %cst_35 : f32 to vector<2x128xf32>
    %68 = arith.addf %66, %67 : vector<2x128xf32>
    %cst_36 = arith.constant 5.000000e-01 : f32
    %69 = vector.broadcast %cst_36 : f32 to vector<2x128xf32>
    %70 = arith.mulf %69, %68 : vector<2x128xf32>
    %71 = arith.select %27, %66, %70 : vector<2x128xi1>, vector<2x128xf32>
    %72 = vector.extract_strided_slice %71 {offsets = [0, 0], sizes = [2, 32], strides = [1, 1]} : vector<2x128xf32> to vector<2x32xf32>
    %73 = vector.extract_strided_slice %71 {offsets = [0, 32], sizes = [2, 32], strides = [1, 1]} : vector<2x128xf32> to vector<2x32xf32>
    %74 = vector.extract_strided_slice %71 {offsets = [0, 64], sizes = [2, 32], strides = [1, 1]} : vector<2x128xf32> to vector<2x32xf32>
    %75 = vector.extract_strided_slice %71 {offsets = [0, 96], sizes = [2, 32], strides = [1, 1]} : vector<2x128xf32> to vector<2x32xf32>
    %76 = arith.mulf %73, %32 : vector<2x32xf32>
    %77 = arith.mulf %72, %74 : vector<2x32xf32>
    %78 = arith.addf %76, %77 : vector<2x32xf32>
    %79 = math.tanh %78 : vector<2x32xf32>
    %80 = arith.mulf %75, %79 : vector<2x32xf32>
    %81 = arith.index_cast %c0_i32 : i32 to index
    %c0_37 = arith.constant 0 : index
    %c0_38 = arith.constant 0 : index
    %82 = vector.load %arg12[%81, %c0_37, %c0_38] : memref<8x2x128xf32, #tpu.memory_space<vmem>>, vector<1x2x128xf32>
    %83 = vector.shape_cast %82 : vector<1x2x128xf32> to vector<2x128xf32>
    %84 = arith.truncf %64 : vector<2x32xf32> to vector<2x32xbf16>
    %c0_39 = arith.constant 0 : index
    %c0_40 = arith.constant 0 : index
    %85 = vector.load %arg6[%c0_39, %c0_40] : memref<32x128xbf16, #tpu.memory_space<vmem>>, vector<32x128xbf16>
    %cst_41 = arith.constant dense<0.000000e+00> : vector<2x128xf32>
    %86 = tpu.matmul %84, %85, %cst_41 {dimension_numbers = #tpu.dot_dimension_numbers<[1], [0], [0], [1], [0, 0, 1, 1], [], []>} : vector<2x32xbf16>, vector<32x128xbf16>, vector<2x128xf32> -> vector<2x128xf32>
    %87 = arith.addf %83, %86 : vector<2x128xf32>
    %88 = arith.index_cast %c0_i32 : i32 to index
    %c0_42 = arith.constant 0 : index
    %c0_43 = arith.constant 0 : index
    %89 = vector.load %arg12[%88, %c0_42, %c0_43] : memref<8x2x128xf32, #tpu.memory_space<vmem>>, vector<1x2x128xf32>
    %90 = vector.shape_cast %89 : vector<1x2x128xf32> to vector<2x128xf32>
    %91 = vector.shape_cast %87 : vector<2x128xf32> to vector<1x2x128xf32>
    tpu.vector_store %arg12[%88, %c0_42, %c0_43], %91 {strides = array<i32>} : memref<8x2x128xf32, #tpu.memory_space<vmem>>, vector<1x2x128xf32>,
    %92 = arith.index_cast %33 : i32 to index
    %c0_44 = arith.constant 0 : index
    %c0_45 = arith.constant 0 : index
    %93 = vector.load %arg12[%92, %c0_44, %c0_45] : memref<8x2x128xf32, #tpu.memory_space<vmem>>, vector<1x2x128xf32>
    %94 = vector.shape_cast %93 : vector<1x2x128xf32> to vector<2x128xf32>
    %95 = arith.truncf %80 : vector<2x32xf32> to vector<2x32xbf16>
    %c0_46 = arith.constant 0 : index
    %c0_47 = arith.constant 0 : index
    %96 = vector.load %arg7[%c0_46, %c0_47] : memref<32x128xbf16, #tpu.memory_space<vmem>>, vector<32x128xbf16>
    %cst_48 = arith.constant dense<0.000000e+00> : vector<2x128xf32>
    %97 = tpu.matmul %95, %96, %cst_48 {dimension_numbers = #tpu.dot_dimension_numbers<[1], [0], [0], [1], [0, 0, 1, 1], [], []>} : vector<2x32xbf16>, vector<32x128xbf16>, vector<2x128xf32> -> vector<2x128xf32>
    %98 = arith.addf %94, %97 : vector<2x128xf32>
    %99 = arith.index_cast %33 : i32 to index
    %c0_49 = arith.constant 0 : index
    %c0_50 = arith.constant 0 : index
    %100 = vector.load %arg12[%99, %c0_49, %c0_50] : memref<8x2x128xf32, #tpu.memory_space<vmem>>, vector<1x2x128xf32>
    %101 = vector.shape_cast %100 : vector<1x2x128xf32> to vector<2x128xf32>
    %102 = vector.shape_cast %98 : vector<2x128xf32> to vector<1x2x128xf32>
    tpu.vector_store %arg12[%99, %c0_49, %c0_50], %102 {strides = array<i32>} : memref<8x2x128xf32, #tpu.memory_space<vmem>>, vector<1x2x128xf32>,
    %103 = tpu.concatenate %64, %80 in 1 : vector<2x32xf32>, vector<2x32xf32> -> vector<2x64xf32>
    %c1_i32 = arith.constant 1 : i32
    %c7_i32_51 = arith.constant 7 : i32
    %104 = arith.subi %c7_i32_51, %c1_i32 : i32
    %105 = arith.truncf %103 : vector<2x64xf32> to vector<2x64xbf16>
    %c0_52 = arith.constant 0 : index
    %c0_53 = arith.constant 0 : index
    %106 = vector.load %arg5[%c0_52, %c0_53] : memref<64x256xbf16, #tpu.memory_space<vmem>>, vector<64x256xbf16>
    %cst_54 = arith.constant dense<0.000000e+00> : vector<2x256xf32>
    %107 = tpu.matmul %105, %106, %cst_54 {dimension_numbers = #tpu.dot_dimension_numbers<[1], [0], [0], [1], [0, 0, 1, 1], [], []>} : vector<2x64xbf16>, vector<64x256xbf16>, vector<2x256xf32> -> vector<2x256xf32>
    %108 = arith.index_cast %c1_i32 : i32 to index
    %c0_55 = arith.constant 0 : index
    %c0_56 = arith.constant 0 : index
    %109 = vector.load %arg10[%108, %c0_55, %c0_56] : memref<8x2x128xbf16, #tpu.memory_space<vmem>>, vector<1x2x128xbf16>
    %110 = vector.shape_cast %109 : vector<1x2x128xbf16> to vector<2x128xbf16>
    %111 = arith.extf %110 : vector<2x128xbf16> to vector<2x128xf32>
    %112 = vector.extract_strided_slice %107 {offsets = [0, 0], sizes = [2, 128], strides = [1, 1]} : vector<2x256xf32> to vector<2x128xf32>
    %113 = arith.addf %111, %112 : vector<2x128xf32>
    %114 = arith.index_cast %104 : i32 to index
    %c0_57 = arith.constant 0 : index
    %c0_58 = arith.constant 0 : index
    %115 = vector.load %arg11[%114, %c0_57, %c0_58] : memref<8x2x128xbf16, #tpu.memory_space<vmem>>, vector<1x2x128xbf16>
    %116 = vector.shape_cast %115 : vector<1x2x128xbf16> to vector<2x128xbf16>
    %117 = arith.extf %116 : vector<2x128xbf16> to vector<2x128xf32>
    %118 = vector.extract_strided_slice %107 {offsets = [0, 128], sizes = [2, 128], strides = [1, 1]} : vector<2x256xf32> to vector<2x128xf32>
    %119 = arith.addf %117, %118 : vector<2x128xf32>
    %120 = arith.mulf %113, %30 : vector<2x128xf32>
    %121 = math.tanh %120 : vector<2x128xf32>
    %cst_59 = arith.constant 1.000000e+00 : f32
    %122 = vector.broadcast %cst_59 : f32 to vector<2x128xf32>
    %123 = arith.addf %121, %122 : vector<2x128xf32>
    %cst_60 = arith.constant 5.000000e-01 : f32
    %124 = vector.broadcast %cst_60 : f32 to vector<2x128xf32>
    %125 = arith.mulf %124, %123 : vector<2x128xf32>
    %126 = arith.select %27, %121, %125 : vector<2x128xi1>, vector<2x128xf32>
    %127 = vector.extract_strided_slice %126 {offsets = [0, 0], sizes = [2, 32], strides = [1, 1]} : vector<2x128xf32> to vector<2x32xf32>
    %128 = vector.extract_strided_slice %126 {offsets = [0, 32], sizes = [2, 32], strides = [1, 1]} : vector<2x128xf32> to vector<2x32xf32>
    %129 = vector.extract_strided_slice %126 {offsets = [0, 64], sizes = [2, 32], strides = [1, 1]} : vector<2x128xf32> to vector<2x32xf32>
    %130 = vector.extract_strided_slice %126 {offsets = [0, 96], sizes = [2, 32], strides = [1, 1]} : vector<2x128xf32> to vector<2x32xf32>
    %131 = arith.mulf %128, %62 : vector<2x32xf32>
    %132 = arith.mulf %127, %129 : vector<2x32xf32>
    %133 = arith.addf %131, %132 : vector<2x32xf32>
    %134 = math.tanh %133 : vector<2x32xf32>
    %135 = arith.mulf %130, %134 : vector<2x32xf32>
    %136 = arith.mulf %119, %30 : vector<2x128xf32>
    %137 = math.tanh %136 : vector<2x128xf32>
    %cst_61 = arith.constant 1.000000e+00 : f32
    %138 = vector.broadcast %cst_61 : f32 to vector<2x128xf32>
    %139 = arith.addf %137, %138 : vector<2x128xf32>
    %cst_62 = arith.constant 5.000000e-01 : f32
    %140 = vector.broadcast %cst_62 : f32 to vector<2x128xf32>
    %141 = arith.mulf %140, %139 : vector<2x128xf32>
    %142 = arith.select %27, %137, %141 : vector<2x128xi1>, vector<2x128xf32>
    %143 = vector.extract_strided_slice %142 {offsets = [0, 0], sizes = [2, 32], strides = [1, 1]} : vector<2x128xf32> to vector<2x32xf32>
    %144 = vector.extract_strided_slice %142 {offsets = [0, 32], sizes = [2, 32], strides = [1, 1]} : vector<2x128xf32> to vector<2x32xf32>
    %145 = vector.extract_strided_slice %142 {offsets = [0, 64], sizes = [2, 32], strides = [1, 1]} : vector<2x128xf32> to vector<2x32xf32>
    %146 = vector.extract_strided_slice %142 {offsets = [0, 96], sizes = [2, 32], strides = [1, 1]} : vector<2x128xf32> to vector<2x32xf32>
    %147 = arith.mulf %144, %78 : vector<2x32xf32>
    %148 = arith.mulf %143, %145 : vector<2x32xf32>
    %149 = arith.addf %147, %148 : vector<2x32xf32>
    %150 = math.tanh %149 : vector<2x32xf32>
    %151 = arith.mulf %146, %150 : vector<2x32xf32>
    %152 = arith.index_cast %c1_i32 : i32 to index
    %c0_63 = arith.constant 0 : index
    %c0_64 = arith.constant 0 : index
    %153 = vector.load %arg12[%152, %c0_63, %c0_64] : memref<8x2x128xf32, #tpu.memory_space<vmem>>, vector<1x2x128xf32>
    %154 = vector.shape_cast %153 : vector<1x2x128xf32> to vector<2x128xf32>
    %155 = arith.truncf %135 : vector<2x32xf32> to vector<2x32xbf16>
    %c0_65 = arith.constant 0 : index
    %c0_66 = arith.constant 0 : index
    %156 = vector.load %arg6[%c0_65, %c0_66] : memref<32x128xbf16, #tpu.memory_space<vmem>>, vector<32x128xbf16>
    %cst_67 = arith.constant dense<0.000000e+00> : vector<2x128xf32>
    %157 = tpu.matmul %155, %156, %cst_67 {dimension_numbers = #tpu.dot_dimension_numbers<[1], [0], [0], [1], [0, 0, 1, 1], [], []>} : vector<2x32xbf16>, vector<32x128xbf16>, vector<2x128xf32> -> vector<2x128xf32>
    %158 = arith.addf %154, %157 : vector<2x128xf32>
    %159 = arith.index_cast %c1_i32 : i32 to index
    %c0_68 = arith.constant 0 : index
    %c0_69 = arith.constant 0 : index
    %160 = vector.load %arg12[%159, %c0_68, %c0_69] : memref<8x2x128xf32, #tpu.memory_space<vmem>>, vector<1x2x128xf32>
    %161 = vector.shape_cast %160 : vector<1x2x128xf32> to vector<2x128xf32>
    %162 = vector.shape_cast %158 : vector<2x128xf32> to vector<1x2x128xf32>
    tpu.vector_store %arg12[%159, %c0_68, %c0_69], %162 {strides = array<i32>} : memref<8x2x128xf32, #tpu.memory_space<vmem>>, vector<1x2x128xf32>,
    %163 = arith.index_cast %104 : i32 to index
    %c0_70 = arith.constant 0 : index
    %c0_71 = arith.constant 0 : index
    %164 = vector.load %arg12[%163, %c0_70, %c0_71] : memref<8x2x128xf32, #tpu.memory_space<vmem>>, vector<1x2x128xf32>
    %165 = vector.shape_cast %164 : vector<1x2x128xf32> to vector<2x128xf32>
    %166 = arith.truncf %151 : vector<2x32xf32> to vector<2x32xbf16>
    %c0_72 = arith.constant 0 : index
    %c0_73 = arith.constant 0 : index
    %167 = vector.load %arg7[%c0_72, %c0_73] : memref<32x128xbf16, #tpu.memory_space<vmem>>, vector<32x128xbf16>
    %cst_74 = arith.constant dense<0.000000e+00> : vector<2x128xf32>
    %168 = tpu.matmul %166, %167, %cst_74 {dimension_numbers = #tpu.dot_dimension_numbers<[1], [0], [0], [1], [0, 0, 1, 1], [], []>} : vector<2x32xbf16>, vector<32x128xbf16>, vector<2x128xf32> -> vector<2x128xf32>
    %169 = arith.addf %165, %168 : vector<2x128xf32>
    %170 = arith.index_cast %104 : i32 to index
    %c0_75 = arith.constant 0 : index
    %c0_76 = arith.constant 0 : index
    %171 = vector.load %arg12[%170, %c0_75, %c0_76] : memref<8x2x128xf32, #tpu.memory_space<vmem>>, vector<1x2x128xf32>
    %172 = vector.shape_cast %171 : vector<1x2x128xf32> to vector<2x128xf32>
    %173 = vector.shape_cast %169 : vector<2x128xf32> to vector<1x2x128xf32>
    tpu.vector_store %arg12[%170, %c0_75, %c0_76], %173 {strides = array<i32>} : memref<8x2x128xf32, #tpu.memory_space<vmem>>, vector<1x2x128xf32>,
    %174 = tpu.concatenate %135, %151 in 1 : vector<2x32xf32>, vector<2x32xf32> -> vector<2x64xf32>
    %c2_i32 = arith.constant 2 : i32
    %c7_i32_77 = arith.constant 7 : i32
    %175 = arith.subi %c7_i32_77, %c2_i32 : i32
    %176 = arith.truncf %174 : vector<2x64xf32> to vector<2x64xbf16>
    %c0_78 = arith.constant 0 : index
    %c0_79 = arith.constant 0 : index
    %177 = vector.load %arg5[%c0_78, %c0_79] : memref<64x256xbf16, #tpu.memory_space<vmem>>, vector<64x256xbf16>
    %cst_80 = arith.constant dense<0.000000e+00> : vector<2x256xf32>
    %178 = tpu.matmul %176, %177, %cst_80 {dimension_numbers = #tpu.dot_dimension_numbers<[1], [0], [0], [1], [0, 0, 1, 1], [], []>} : vector<2x64xbf16>, vector<64x256xbf16>, vector<2x256xf32> -> vector<2x256xf32>
    %179 = arith.index_cast %c2_i32 : i32 to index
    %c0_81 = arith.constant 0 : index
    %c0_82 = arith.constant 0 : index
    %180 = vector.load %arg10[%179, %c0_81, %c0_82] : memref<8x2x128xbf16, #tpu.memory_space<vmem>>, vector<1x2x128xbf16>
    %181 = vector.shape_cast %180 : vector<1x2x128xbf16> to vector<2x128xbf16>
    %182 = arith.extf %181 : vector<2x128xbf16> to vector<2x128xf32>
    %183 = vector.extract_strided_slice %178 {offsets = [0, 0], sizes = [2, 128], strides = [1, 1]} : vector<2x256xf32> to vector<2x128xf32>
    %184 = arith.addf %182, %183 : vector<2x128xf32>
    %185 = arith.index_cast %175 : i32 to index
    %c0_83 = arith.constant 0 : index
    %c0_84 = arith.constant 0 : index
    %186 = vector.load %arg11[%185, %c0_83, %c0_84] : memref<8x2x128xbf16, #tpu.memory_space<vmem>>, vector<1x2x128xbf16>
    %187 = vector.shape_cast %186 : vector<1x2x128xbf16> to vector<2x128xbf16>
    %188 = arith.extf %187 : vector<2x128xbf16> to vector<2x128xf32>
    %189 = vector.extract_strided_slice %178 {offsets = [0, 128], sizes = [2, 128], strides = [1, 1]} : vector<2x256xf32> to vector<2x128xf32>
    %190 = arith.addf %188, %189 : vector<2x128xf32>
    %191 = arith.mulf %184, %30 : vector<2x128xf32>
    %192 = math.tanh %191 : vector<2x128xf32>
    %cst_85 = arith.constant 1.000000e+00 : f32
    %193 = vector.broadcast %cst_85 : f32 to vector<2x128xf32>
    %194 = arith.addf %192, %193 : vector<2x128xf32>
    %cst_86 = arith.constant 5.000000e-01 : f32
    %195 = vector.broadcast %cst_86 : f32 to vector<2x128xf32>
    %196 = arith.mulf %195, %194 : vector<2x128xf32>
    %197 = arith.select %27, %192, %196 : vector<2x128xi1>, vector<2x128xf32>
    %198 = vector.extract_strided_slice %197 {offsets = [0, 0], sizes = [2, 32], strides = [1, 1]} : vector<2x128xf32> to vector<2x32xf32>
    %199 = vector.extract_strided_slice %197 {offsets = [0, 32], sizes = [2, 32], strides = [1, 1]} : vector<2x128xf32> to vector<2x32xf32>
    %200 = vector.extract_strided_slice %197 {offsets = [0, 64], sizes = [2, 32], strides = [1, 1]} : vector<2x128xf32> to vector<2x32xf32>
    %201 = vector.extract_strided_slice %197 {offsets = [0, 96], sizes = [2, 32], strides = [1, 1]} : vector<2x128xf32> to vector<2x32xf32>
    %202 = arith.mulf %199, %133 : vector<2x32xf32>
    %203 = arith.mulf %198, %200 : vector<2x32xf32>
    %204 = arith.addf %202, %203 : vector<2x32xf32>
    %205 = math.tanh %204 : vector<2x32xf32>
    %206 = arith.mulf %201, %205 : vector<2x32xf32>
    %207 = arith.mulf %190, %30 : vector<2x128xf32>
    %208 = math.tanh %207 : vector<2x128xf32>
    %cst_87 = arith.constant 1.000000e+00 : f32
    %209 = vector.broadcast %cst_87 : f32 to vector<2x128xf32>
    %210 = arith.addf %208, %209 : vector<2x128xf32>
    %cst_88 = arith.constant 5.000000e-01 : f32
    %211 = vector.broadcast %cst_88 : f32 to vector<2x128xf32>
    %212 = arith.mulf %211, %210 : vector<2x128xf32>
    %213 = arith.select %27, %208, %212 : vector<2x128xi1>, vector<2x128xf32>
    %214 = vector.extract_strided_slice %213 {offsets = [0, 0], sizes = [2, 32], strides = [1, 1]} : vector<2x128xf32> to vector<2x32xf32>
    %215 = vector.extract_strided_slice %213 {offsets = [0, 32], sizes = [2, 32], strides = [1, 1]} : vector<2x128xf32> to vector<2x32xf32>
    %216 = vector.extract_strided_slice %213 {offsets = [0, 64], sizes = [2, 32], strides = [1, 1]} : vector<2x128xf32> to vector<2x32xf32>
    %217 = vector.extract_strided_slice %213 {offsets = [0, 96], sizes = [2, 32], strides = [1, 1]} : vector<2x128xf32> to vector<2x32xf32>
    %218 = arith.mulf %215, %149 : vector<2x32xf32>
    %219 = arith.mulf %214, %216 : vector<2x32xf32>
    %220 = arith.addf %218, %219 : vector<2x32xf32>
    %221 = math.tanh %220 : vector<2x32xf32>
    %222 = arith.mulf %217, %221 : vector<2x32xf32>
    %223 = arith.index_cast %c2_i32 : i32 to index
    %c0_89 = arith.constant 0 : index
    %c0_90 = arith.constant 0 : index
    %224 = vector.load %arg12[%223, %c0_89, %c0_90] : memref<8x2x128xf32, #tpu.memory_space<vmem>>, vector<1x2x128xf32>
    %225 = vector.shape_cast %224 : vector<1x2x128xf32> to vector<2x128xf32>
    %226 = arith.truncf %206 : vector<2x32xf32> to vector<2x32xbf16>
    %c0_91 = arith.constant 0 : index
    %c0_92 = arith.constant 0 : index
    %227 = vector.load %arg6[%c0_91, %c0_92] : memref<32x128xbf16, #tpu.memory_space<vmem>>, vector<32x128xbf16>
    %cst_93 = arith.constant dense<0.000000e+00> : vector<2x128xf32>
    %228 = tpu.matmul %226, %227, %cst_93 {dimension_numbers = #tpu.dot_dimension_numbers<[1], [0], [0], [1], [0, 0, 1, 1], [], []>} : vector<2x32xbf16>, vector<32x128xbf16>, vector<2x128xf32> -> vector<2x128xf32>
    %229 = arith.addf %225, %228 : vector<2x128xf32>
    %230 = arith.index_cast %c2_i32 : i32 to index
    %c0_94 = arith.constant 0 : index
    %c0_95 = arith.constant 0 : index
    %231 = vector.load %arg12[%230, %c0_94, %c0_95] : memref<8x2x128xf32, #tpu.memory_space<vmem>>, vector<1x2x128xf32>
    %232 = vector.shape_cast %231 : vector<1x2x128xf32> to vector<2x128xf32>
    %233 = vector.shape_cast %229 : vector<2x128xf32> to vector<1x2x128xf32>
    tpu.vector_store %arg12[%230, %c0_94, %c0_95], %233 {strides = array<i32>} : memref<8x2x128xf32, #tpu.memory_space<vmem>>, vector<1x2x128xf32>,
    %234 = arith.index_cast %175 : i32 to index
    %c0_96 = arith.constant 0 : index
    %c0_97 = arith.constant 0 : index
    %235 = vector.load %arg12[%234, %c0_96, %c0_97] : memref<8x2x128xf32, #tpu.memory_space<vmem>>, vector<1x2x128xf32>
    %236 = vector.shape_cast %235 : vector<1x2x128xf32> to vector<2x128xf32>
    %237 = arith.truncf %222 : vector<2x32xf32> to vector<2x32xbf16>
    %c0_98 = arith.constant 0 : index
    %c0_99 = arith.constant 0 : index
    %238 = vector.load %arg7[%c0_98, %c0_99] : memref<32x128xbf16, #tpu.memory_space<vmem>>, vector<32x128xbf16>
    %cst_100 = arith.constant dense<0.000000e+00> : vector<2x128xf32>
    %239 = tpu.matmul %237, %238, %cst_100 {dimension_numbers = #tpu.dot_dimension_numbers<[1], [0], [0], [1], [0, 0, 1, 1], [], []>} : vector<2x32xbf16>, vector<32x128xbf16>, vector<2x128xf32> -> vector<2x128xf32>
    %240 = arith.addf %236, %239 : vector<2x128xf32>
    %241 = arith.index_cast %175 : i32 to index
    %c0_101 = arith.constant 0 : index
    %c0_102 = arith.constant 0 : index
    %242 = vector.load %arg12[%241, %c0_101, %c0_102] : memref<8x2x128xf32, #tpu.memory_space<vmem>>, vector<1x2x128xf32>
    %243 = vector.shape_cast %242 : vector<1x2x128xf32> to vector<2x128xf32>
    %244 = vector.shape_cast %240 : vector<2x128xf32> to vector<1x2x128xf32>
    tpu.vector_store %arg12[%241, %c0_101, %c0_102], %244 {strides = array<i32>} : memref<8x2x128xf32, #tpu.memory_space<vmem>>, vector<1x2x128xf32>,
    %245 = tpu.concatenate %206, %222 in 1 : vector<2x32xf32>, vector<2x32xf32> -> vector<2x64xf32>
    %c3_i32 = arith.constant 3 : i32
    %c7_i32_103 = arith.constant 7 : i32
    %246 = arith.subi %c7_i32_103, %c3_i32 : i32
    %247 = arith.truncf %245 : vector<2x64xf32> to vector<2x64xbf16>
    %c0_104 = arith.constant 0 : index
    %c0_105 = arith.constant 0 : index
    %248 = vector.load %arg5[%c0_104, %c0_105] : memref<64x256xbf16, #tpu.memory_space<vmem>>, vector<64x256xbf16>
    %cst_106 = arith.constant dense<0.000000e+00> : vector<2x256xf32>
    %249 = tpu.matmul %247, %248, %cst_106 {dimension_numbers = #tpu.dot_dimension_numbers<[1], [0], [0], [1], [0, 0, 1, 1], [], []>} : vector<2x64xbf16>, vector<64x256xbf16>, vector<2x256xf32> -> vector<2x256xf32>
    %250 = arith.index_cast %c3_i32 : i32 to index
    %c0_107 = arith.constant 0 : index
    %c0_108 = arith.constant 0 : index
    %251 = vector.load %arg10[%250, %c0_107, %c0_108] : memref<8x2x128xbf16, #tpu.memory_space<vmem>>, vector<1x2x128xbf16>
    %252 = vector.shape_cast %251 : vector<1x2x128xbf16> to vector<2x128xbf16>
    %253 = arith.extf %252 : vector<2x128xbf16> to vector<2x128xf32>
    %254 = vector.extract_strided_slice %249 {offsets = [0, 0], sizes = [2, 128], strides = [1, 1]} : vector<2x256xf32> to vector<2x128xf32>
    %255 = arith.addf %253, %254 : vector<2x128xf32>
    %256 = arith.index_cast %246 : i32 to index
    %c0_109 = arith.constant 0 : index
    %c0_110 = arith.constant 0 : index
    %257 = vector.load %arg11[%256, %c0_109, %c0_110] : memref<8x2x128xbf16, #tpu.memory_space<vmem>>, vector<1x2x128xbf16>
    %258 = vector.shape_cast %257 : vector<1x2x128xbf16> to vector<2x128xbf16>
    %259 = arith.extf %258 : vector<2x128xbf16> to vector<2x128xf32>
    %260 = vector.extract_strided_slice %249 {offsets = [0, 128], sizes = [2, 128], strides = [1, 1]} : vector<2x256xf32> to vector<2x128xf32>
    %261 = arith.addf %259, %260 : vector<2x128xf32>
    %262 = arith.mulf %255, %30 : vector<2x128xf32>
    %263 = math.tanh %262 : vector<2x128xf32>
    %cst_111 = arith.constant 1.000000e+00 : f32
    %264 = vector.broadcast %cst_111 : f32 to vector<2x128xf32>
    %265 = arith.addf %263, %264 : vector<2x128xf32>
    %cst_112 = arith.constant 5.000000e-01 : f32
    %266 = vector.broadcast %cst_112 : f32 to vector<2x128xf32>
    %267 = arith.mulf %266, %265 : vector<2x128xf32>
    %268 = arith.select %27, %263, %267 : vector<2x128xi1>, vector<2x128xf32>
    %269 = vector.extract_strided_slice %268 {offsets = [0, 0], sizes = [2, 32], strides = [1, 1]} : vector<2x128xf32> to vector<2x32xf32>
    %270 = vector.extract_strided_slice %268 {offsets = [0, 32], sizes = [2, 32], strides = [1, 1]} : vector<2x128xf32> to vector<2x32xf32>
    %271 = vector.extract_strided_slice %268 {offsets = [0, 64], sizes = [2, 32], strides = [1, 1]} : vector<2x128xf32> to vector<2x32xf32>
    %272 = vector.extract_strided_slice %268 {offsets = [0, 96], sizes = [2, 32], strides = [1, 1]} : vector<2x128xf32> to vector<2x32xf32>
    %273 = arith.mulf %270, %204 : vector<2x32xf32>
    %274 = arith.mulf %269, %271 : vector<2x32xf32>
    %275 = arith.addf %273, %274 : vector<2x32xf32>
    %276 = math.tanh %275 : vector<2x32xf32>
    %277 = arith.mulf %272, %276 : vector<2x32xf32>
    %278 = arith.mulf %261, %30 : vector<2x128xf32>
    %279 = math.tanh %278 : vector<2x128xf32>
    %cst_113 = arith.constant 1.000000e+00 : f32
    %280 = vector.broadcast %cst_113 : f32 to vector<2x128xf32>
    %281 = arith.addf %279, %280 : vector<2x128xf32>
    %cst_114 = arith.constant 5.000000e-01 : f32
    %282 = vector.broadcast %cst_114 : f32 to vector<2x128xf32>
    %283 = arith.mulf %282, %281 : vector<2x128xf32>
    %284 = arith.select %27, %279, %283 : vector<2x128xi1>, vector<2x128xf32>
    %285 = vector.extract_strided_slice %284 {offsets = [0, 0], sizes = [2, 32], strides = [1, 1]} : vector<2x128xf32> to vector<2x32xf32>
    %286 = vector.extract_strided_slice %284 {offsets = [0, 32], sizes = [2, 32], strides = [1, 1]} : vector<2x128xf32> to vector<2x32xf32>
    %287 = vector.extract_strided_slice %284 {offsets = [0, 64], sizes = [2, 32], strides = [1, 1]} : vector<2x128xf32> to vector<2x32xf32>
    %288 = vector.extract_strided_slice %284 {offsets = [0, 96], sizes = [2, 32], strides = [1, 1]} : vector<2x128xf32> to vector<2x32xf32>
    %289 = arith.mulf %286, %220 : vector<2x32xf32>
    %290 = arith.mulf %285, %287 : vector<2x32xf32>
    %291 = arith.addf %289, %290 : vector<2x32xf32>
    %292 = math.tanh %291 : vector<2x32xf32>
    %293 = arith.mulf %288, %292 : vector<2x32xf32>
    %294 = arith.index_cast %c3_i32 : i32 to index
    %c0_115 = arith.constant 0 : index
    %c0_116 = arith.constant 0 : index
    %295 = vector.load %arg12[%294, %c0_115, %c0_116] : memref<8x2x128xf32, #tpu.memory_space<vmem>>, vector<1x2x128xf32>
    %296 = vector.shape_cast %295 : vector<1x2x128xf32> to vector<2x128xf32>
    %297 = arith.truncf %277 : vector<2x32xf32> to vector<2x32xbf16>
    %c0_117 = arith.constant 0 : index
    %c0_118 = arith.constant 0 : index
    %298 = vector.load %arg6[%c0_117, %c0_118] : memref<32x128xbf16, #tpu.memory_space<vmem>>, vector<32x128xbf16>
    %cst_119 = arith.constant dense<0.000000e+00> : vector<2x128xf32>
    %299 = tpu.matmul %297, %298, %cst_119 {dimension_numbers = #tpu.dot_dimension_numbers<[1], [0], [0], [1], [0, 0, 1, 1], [], []>} : vector<2x32xbf16>, vector<32x128xbf16>, vector<2x128xf32> -> vector<2x128xf32>
    %300 = arith.addf %296, %299 : vector<2x128xf32>
    %301 = arith.index_cast %c3_i32 : i32 to index
    %c0_120 = arith.constant 0 : index
    %c0_121 = arith.constant 0 : index
    %302 = vector.load %arg12[%301, %c0_120, %c0_121] : memref<8x2x128xf32, #tpu.memory_space<vmem>>, vector<1x2x128xf32>
    %303 = vector.shape_cast %302 : vector<1x2x128xf32> to vector<2x128xf32>
    %304 = vector.shape_cast %300 : vector<2x128xf32> to vector<1x2x128xf32>
    tpu.vector_store %arg12[%301, %c0_120, %c0_121], %304 {strides = array<i32>} : memref<8x2x128xf32, #tpu.memory_space<vmem>>, vector<1x2x128xf32>,
    %305 = arith.index_cast %246 : i32 to index
    %c0_122 = arith.constant 0 : index
    %c0_123 = arith.constant 0 : index
    %306 = vector.load %arg12[%305, %c0_122, %c0_123] : memref<8x2x128xf32, #tpu.memory_space<vmem>>, vector<1x2x128xf32>
    %307 = vector.shape_cast %306 : vector<1x2x128xf32> to vector<2x128xf32>
    %308 = arith.truncf %293 : vector<2x32xf32> to vector<2x32xbf16>
    %c0_124 = arith.constant 0 : index
    %c0_125 = arith.constant 0 : index
    %309 = vector.load %arg7[%c0_124, %c0_125] : memref<32x128xbf16, #tpu.memory_space<vmem>>, vector<32x128xbf16>
    %cst_126 = arith.constant dense<0.000000e+00> : vector<2x128xf32>
    %310 = tpu.matmul %308, %309, %cst_126 {dimension_numbers = #tpu.dot_dimension_numbers<[1], [0], [0], [1], [0, 0, 1, 1], [], []>} : vector<2x32xbf16>, vector<32x128xbf16>, vector<2x128xf32> -> vector<2x128xf32>
    %311 = arith.addf %307, %310 : vector<2x128xf32>
    %312 = arith.index_cast %246 : i32 to index
    %c0_127 = arith.constant 0 : index
    %c0_128 = arith.constant 0 : index
    %313 = vector.load %arg12[%312, %c0_127, %c0_128] : memref<8x2x128xf32, #tpu.memory_space<vmem>>, vector<1x2x128xf32>
    %314 = vector.shape_cast %313 : vector<1x2x128xf32> to vector<2x128xf32>
    %315 = vector.shape_cast %311 : vector<2x128xf32> to vector<1x2x128xf32>
    tpu.vector_store %arg12[%312, %c0_127, %c0_128], %315 {strides = array<i32>} : memref<8x2x128xf32, #tpu.memory_space<vmem>>, vector<1x2x128xf32>,
    %316 = tpu.concatenate %277, %293 in 1 : vector<2x32xf32>, vector<2x32xf32> -> vector<2x64xf32>
    %c4_i32 = arith.constant 4 : i32
    %c7_i32_129 = arith.constant 7 : i32
    %317 = arith.subi %c7_i32_129, %c4_i32 : i32
    %318 = arith.truncf %316 : vector<2x64xf32> to vector<2x64xbf16>
    %c0_130 = arith.constant 0 : index
    %c0_131 = arith.constant 0 : index
    %319 = vector.load %arg5[%c0_130, %c0_131] : memref<64x256xbf16, #tpu.memory_space<vmem>>, vector<64x256xbf16>
    %cst_132 = arith.constant dense<0.000000e+00> : vector<2x256xf32>
    %320 = tpu.matmul %318, %319, %cst_132 {dimension_numbers = #tpu.dot_dimension_numbers<[1], [0], [0], [1], [0, 0, 1, 1], [], []>} : vector<2x64xbf16>, vector<64x256xbf16>, vector<2x256xf32> -> vector<2x256xf32>
    %321 = arith.index_cast %c4_i32 : i32 to index
    %c0_133 = arith.constant 0 : index
    %c0_134 = arith.constant 0 : index
    %322 = vector.load %arg10[%321, %c0_133, %c0_134] : memref<8x2x128xbf16, #tpu.memory_space<vmem>>, vector<1x2x128xbf16>
    %323 = vector.shape_cast %322 : vector<1x2x128xbf16> to vector<2x128xbf16>
    %324 = arith.extf %323 : vector<2x128xbf16> to vector<2x128xf32>
    %325 = vector.extract_strided_slice %320 {offsets = [0, 0], sizes = [2, 128], strides = [1, 1]} : vector<2x256xf32> to vector<2x128xf32>
    %326 = arith.addf %324, %325 : vector<2x128xf32>
    %327 = arith.index_cast %317 : i32 to index
    %c0_135 = arith.constant 0 : index
    %c0_136 = arith.constant 0 : index
    %328 = vector.load %arg11[%327, %c0_135, %c0_136] : memref<8x2x128xbf16, #tpu.memory_space<vmem>>, vector<1x2x128xbf16>
    %329 = vector.shape_cast %328 : vector<1x2x128xbf16> to vector<2x128xbf16>
    %330 = arith.extf %329 : vector<2x128xbf16> to vector<2x128xf32>
    %331 = vector.extract_strided_slice %320 {offsets = [0, 128], sizes = [2, 128], strides = [1, 1]} : vector<2x256xf32> to vector<2x128xf32>
    %332 = arith.addf %330, %331 : vector<2x128xf32>
    %333 = arith.mulf %326, %30 : vector<2x128xf32>
    %334 = math.tanh %333 : vector<2x128xf32>
    %cst_137 = arith.constant 1.000000e+00 : f32
    %335 = vector.broadcast %cst_137 : f32 to vector<2x128xf32>
    %336 = arith.addf %334, %335 : vector<2x128xf32>
    %cst_138 = arith.constant 5.000000e-01 : f32
    %337 = vector.broadcast %cst_138 : f32 to vector<2x128xf32>
    %338 = arith.mulf %337, %336 : vector<2x128xf32>
    %339 = arith.select %27, %334, %338 : vector<2x128xi1>, vector<2x128xf32>
    %340 = vector.extract_strided_slice %339 {offsets = [0, 0], sizes = [2, 32], strides = [1, 1]} : vector<2x128xf32> to vector<2x32xf32>
    %341 = vector.extract_strided_slice %339 {offsets = [0, 32], sizes = [2, 32], strides = [1, 1]} : vector<2x128xf32> to vector<2x32xf32>
    %342 = vector.extract_strided_slice %339 {offsets = [0, 64], sizes = [2, 32], strides = [1, 1]} : vector<2x128xf32> to vector<2x32xf32>
    %343 = vector.extract_strided_slice %339 {offsets = [0, 96], sizes = [2, 32], strides = [1, 1]} : vector<2x128xf32> to vector<2x32xf32>
    %344 = arith.mulf %341, %275 : vector<2x32xf32>
    %345 = arith.mulf %340, %342 : vector<2x32xf32>
    %346 = arith.addf %344, %345 : vector<2x32xf32>
    %347 = math.tanh %346 : vector<2x32xf32>
    %348 = arith.mulf %343, %347 : vector<2x32xf32>
    %349 = arith.mulf %332, %30 : vector<2x128xf32>
    %350 = math.tanh %349 : vector<2x128xf32>
    %cst_139 = arith.constant 1.000000e+00 : f32
    %351 = vector.broadcast %cst_139 : f32 to vector<2x128xf32>
    %352 = arith.addf %350, %351 : vector<2x128xf32>
    %cst_140 = arith.constant 5.000000e-01 : f32
    %353 = vector.broadcast %cst_140 : f32 to vector<2x128xf32>
    %354 = arith.mulf %353, %352 : vector<2x128xf32>
    %355 = arith.select %27, %350, %354 : vector<2x128xi1>, vector<2x128xf32>
    %356 = vector.extract_strided_slice %355 {offsets = [0, 0], sizes = [2, 32], strides = [1, 1]} : vector<2x128xf32> to vector<2x32xf32>
    %357 = vector.extract_strided_slice %355 {offsets = [0, 32], sizes = [2, 32], strides = [1, 1]} : vector<2x128xf32> to vector<2x32xf32>
    %358 = vector.extract_strided_slice %355 {offsets = [0, 64], sizes = [2, 32], strides = [1, 1]} : vector<2x128xf32> to vector<2x32xf32>
    %359 = vector.extract_strided_slice %355 {offsets = [0, 96], sizes = [2, 32], strides = [1, 1]} : vector<2x128xf32> to vector<2x32xf32>
    %360 = arith.mulf %357, %291 : vector<2x32xf32>
    %361 = arith.mulf %356, %358 : vector<2x32xf32>
    %362 = arith.addf %360, %361 : vector<2x32xf32>
    %363 = math.tanh %362 : vector<2x32xf32>
    %364 = arith.mulf %359, %363 : vector<2x32xf32>
    %365 = arith.index_cast %c4_i32 : i32 to index
    %c0_141 = arith.constant 0 : index
    %c0_142 = arith.constant 0 : index
    %366 = vector.load %arg12[%365, %c0_141, %c0_142] : memref<8x2x128xf32, #tpu.memory_space<vmem>>, vector<1x2x128xf32>
    %367 = vector.shape_cast %366 : vector<1x2x128xf32> to vector<2x128xf32>
    %368 = arith.truncf %348 : vector<2x32xf32> to vector<2x32xbf16>
    %c0_143 = arith.constant 0 : index
    %c0_144 = arith.constant 0 : index
    %369 = vector.load %arg6[%c0_143, %c0_144] : memref<32x128xbf16, #tpu.memory_space<vmem>>, vector<32x128xbf16>
    %cst_145 = arith.constant dense<0.000000e+00> : vector<2x128xf32>
    %370 = tpu.matmul %368, %369, %cst_145 {dimension_numbers = #tpu.dot_dimension_numbers<[1], [0], [0], [1], [0, 0, 1, 1], [], []>} : vector<2x32xbf16>, vector<32x128xbf16>, vector<2x128xf32> -> vector<2x128xf32>
    %371 = arith.addf %367, %370 : vector<2x128xf32>
    %372 = arith.index_cast %c4_i32 : i32 to index
    %c0_146 = arith.constant 0 : index
    %c0_147 = arith.constant 0 : index
    %373 = vector.load %arg12[%372, %c0_146, %c0_147] : memref<8x2x128xf32, #tpu.memory_space<vmem>>, vector<1x2x128xf32>
    %374 = vector.shape_cast %373 : vector<1x2x128xf32> to vector<2x128xf32>
    %375 = vector.shape_cast %371 : vector<2x128xf32> to vector<1x2x128xf32>
    tpu.vector_store %arg12[%372, %c0_146, %c0_147], %375 {strides = array<i32>} : memref<8x2x128xf32, #tpu.memory_space<vmem>>, vector<1x2x128xf32>,
    %376 = arith.index_cast %317 : i32 to index
    %c0_148 = arith.constant 0 : index
    %c0_149 = arith.constant 0 : index
    %377 = vector.load %arg12[%376, %c0_148, %c0_149] : memref<8x2x128xf32, #tpu.memory_space<vmem>>, vector<1x2x128xf32>
    %378 = vector.shape_cast %377 : vector<1x2x128xf32> to vector<2x128xf32>
    %379 = arith.truncf %364 : vector<2x32xf32> to vector<2x32xbf16>
    %c0_150 = arith.constant 0 : index
    %c0_151 = arith.constant 0 : index
    %380 = vector.load %arg7[%c0_150, %c0_151] : memref<32x128xbf16, #tpu.memory_space<vmem>>, vector<32x128xbf16>
    %cst_152 = arith.constant dense<0.000000e+00> : vector<2x128xf32>
    %381 = tpu.matmul %379, %380, %cst_152 {dimension_numbers = #tpu.dot_dimension_numbers<[1], [0], [0], [1], [0, 0, 1, 1], [], []>} : vector<2x32xbf16>, vector<32x128xbf16>, vector<2x128xf32> -> vector<2x128xf32>
    %382 = arith.addf %378, %381 : vector<2x128xf32>
    %383 = arith.index_cast %317 : i32 to index
    %c0_153 = arith.constant 0 : index
    %c0_154 = arith.constant 0 : index
    %384 = vector.load %arg12[%383, %c0_153, %c0_154] : memref<8x2x128xf32, #tpu.memory_space<vmem>>, vector<1x2x128xf32>
    %385 = vector.shape_cast %384 : vector<1x2x128xf32> to vector<2x128xf32>
    %386 = vector.shape_cast %382 : vector<2x128xf32> to vector<1x2x128xf32>
    tpu.vector_store %arg12[%383, %c0_153, %c0_154], %386 {strides = array<i32>} : memref<8x2x128xf32, #tpu.memory_space<vmem>>, vector<1x2x128xf32>,
    %387 = tpu.concatenate %348, %364 in 1 : vector<2x32xf32>, vector<2x32xf32> -> vector<2x64xf32>
    %c5_i32 = arith.constant 5 : i32
    %c7_i32_155 = arith.constant 7 : i32
    %388 = arith.subi %c7_i32_155, %c5_i32 : i32
    %389 = arith.truncf %387 : vector<2x64xf32> to vector<2x64xbf16>
    %c0_156 = arith.constant 0 : index
    %c0_157 = arith.constant 0 : index
    %390 = vector.load %arg5[%c0_156, %c0_157] : memref<64x256xbf16, #tpu.memory_space<vmem>>, vector<64x256xbf16>
    %cst_158 = arith.constant dense<0.000000e+00> : vector<2x256xf32>
    %391 = tpu.matmul %389, %390, %cst_158 {dimension_numbers = #tpu.dot_dimension_numbers<[1], [0], [0], [1], [0, 0, 1, 1], [], []>} : vector<2x64xbf16>, vector<64x256xbf16>, vector<2x256xf32> -> vector<2x256xf32>
    %392 = arith.index_cast %c5_i32 : i32 to index
    %c0_159 = arith.constant 0 : index
    %c0_160 = arith.constant 0 : index
    %393 = vector.load %arg10[%392, %c0_159, %c0_160] : memref<8x2x128xbf16, #tpu.memory_space<vmem>>, vector<1x2x128xbf16>
    %394 = vector.shape_cast %393 : vector<1x2x128xbf16> to vector<2x128xbf16>
    %395 = arith.extf %394 : vector<2x128xbf16> to vector<2x128xf32>
    %396 = vector.extract_strided_slice %391 {offsets = [0, 0], sizes = [2, 128], strides = [1, 1]} : vector<2x256xf32> to vector<2x128xf32>
    %397 = arith.addf %395, %396 : vector<2x128xf32>
    %398 = arith.index_cast %388 : i32 to index
    %c0_161 = arith.constant 0 : index
    %c0_162 = arith.constant 0 : index
    %399 = vector.load %arg11[%398, %c0_161, %c0_162] : memref<8x2x128xbf16, #tpu.memory_space<vmem>>, vector<1x2x128xbf16>
    %400 = vector.shape_cast %399 : vector<1x2x128xbf16> to vector<2x128xbf16>
    %401 = arith.extf %400 : vector<2x128xbf16> to vector<2x128xf32>
    %402 = vector.extract_strided_slice %391 {offsets = [0, 128], sizes = [2, 128], strides = [1, 1]} : vector<2x256xf32> to vector<2x128xf32>
    %403 = arith.addf %401, %402 : vector<2x128xf32>
    %404 = arith.mulf %397, %30 : vector<2x128xf32>
    %405 = math.tanh %404 : vector<2x128xf32>
    %cst_163 = arith.constant 1.000000e+00 : f32
    %406 = vector.broadcast %cst_163 : f32 to vector<2x128xf32>
    %407 = arith.addf %405, %406 : vector<2x128xf32>
    %cst_164 = arith.constant 5.000000e-01 : f32
    %408 = vector.broadcast %cst_164 : f32 to vector<2x128xf32>
    %409 = arith.mulf %408, %407 : vector<2x128xf32>
    %410 = arith.select %27, %405, %409 : vector<2x128xi1>, vector<2x128xf32>
    %411 = vector.extract_strided_slice %410 {offsets = [0, 0], sizes = [2, 32], strides = [1, 1]} : vector<2x128xf32> to vector<2x32xf32>
    %412 = vector.extract_strided_slice %410 {offsets = [0, 32], sizes = [2, 32], strides = [1, 1]} : vector<2x128xf32> to vector<2x32xf32>
    %413 = vector.extract_strided_slice %410 {offsets = [0, 64], sizes = [2, 32], strides = [1, 1]} : vector<2x128xf32> to vector<2x32xf32>
    %414 = vector.extract_strided_slice %410 {offsets = [0, 96], sizes = [2, 32], strides = [1, 1]} : vector<2x128xf32> to vector<2x32xf32>
    %415 = arith.mulf %412, %346 : vector<2x32xf32>
    %416 = arith.mulf %411, %413 : vector<2x32xf32>
    %417 = arith.addf %415, %416 : vector<2x32xf32>
    %418 = math.tanh %417 : vector<2x32xf32>
    %419 = arith.mulf %414, %418 : vector<2x32xf32>
    %420 = arith.mulf %403, %30 : vector<2x128xf32>
    %421 = math.tanh %420 : vector<2x128xf32>
    %cst_165 = arith.constant 1.000000e+00 : f32
    %422 = vector.broadcast %cst_165 : f32 to vector<2x128xf32>
    %423 = arith.addf %421, %422 : vector<2x128xf32>
    %cst_166 = arith.constant 5.000000e-01 : f32
    %424 = vector.broadcast %cst_166 : f32 to vector<2x128xf32>
    %425 = arith.mulf %424, %423 : vector<2x128xf32>
    %426 = arith.select %27, %421, %425 : vector<2x128xi1>, vector<2x128xf32>
    %427 = vector.extract_strided_slice %426 {offsets = [0, 0], sizes = [2, 32], strides = [1, 1]} : vector<2x128xf32> to vector<2x32xf32>
    %428 = vector.extract_strided_slice %426 {offsets = [0, 32], sizes = [2, 32], strides = [1, 1]} : vector<2x128xf32> to vector<2x32xf32>
    %429 = vector.extract_strided_slice %426 {offsets = [0, 64], sizes = [2, 32], strides = [1, 1]} : vector<2x128xf32> to vector<2x32xf32>
    %430 = vector.extract_strided_slice %426 {offsets = [0, 96], sizes = [2, 32], strides = [1, 1]} : vector<2x128xf32> to vector<2x32xf32>
    %431 = arith.mulf %428, %362 : vector<2x32xf32>
    %432 = arith.mulf %427, %429 : vector<2x32xf32>
    %433 = arith.addf %431, %432 : vector<2x32xf32>
    %434 = math.tanh %433 : vector<2x32xf32>
    %435 = arith.mulf %430, %434 : vector<2x32xf32>
    %436 = arith.index_cast %c5_i32 : i32 to index
    %c0_167 = arith.constant 0 : index
    %c0_168 = arith.constant 0 : index
    %437 = vector.load %arg12[%436, %c0_167, %c0_168] : memref<8x2x128xf32, #tpu.memory_space<vmem>>, vector<1x2x128xf32>
    %438 = vector.shape_cast %437 : vector<1x2x128xf32> to vector<2x128xf32>
    %439 = arith.truncf %419 : vector<2x32xf32> to vector<2x32xbf16>
    %c0_169 = arith.constant 0 : index
    %c0_170 = arith.constant 0 : index
    %440 = vector.load %arg6[%c0_169, %c0_170] : memref<32x128xbf16, #tpu.memory_space<vmem>>, vector<32x128xbf16>
    %cst_171 = arith.constant dense<0.000000e+00> : vector<2x128xf32>
    %441 = tpu.matmul %439, %440, %cst_171 {dimension_numbers = #tpu.dot_dimension_numbers<[1], [0], [0], [1], [0, 0, 1, 1], [], []>} : vector<2x32xbf16>, vector<32x128xbf16>, vector<2x128xf32> -> vector<2x128xf32>
    %442 = arith.addf %438, %441 : vector<2x128xf32>
    %443 = arith.index_cast %c5_i32 : i32 to index
    %c0_172 = arith.constant 0 : index
    %c0_173 = arith.constant 0 : index
    %444 = vector.load %arg12[%443, %c0_172, %c0_173] : memref<8x2x128xf32, #tpu.memory_space<vmem>>, vector<1x2x128xf32>
    %445 = vector.shape_cast %444 : vector<1x2x128xf32> to vector<2x128xf32>
    %446 = vector.shape_cast %442 : vector<2x128xf32> to vector<1x2x128xf32>
    tpu.vector_store %arg12[%443, %c0_172, %c0_173], %446 {strides = array<i32>} : memref<8x2x128xf32, #tpu.memory_space<vmem>>, vector<1x2x128xf32>,
    %447 = arith.index_cast %388 : i32 to index
    %c0_174 = arith.constant 0 : index
    %c0_175 = arith.constant 0 : index
    %448 = vector.load %arg12[%447, %c0_174, %c0_175] : memref<8x2x128xf32, #tpu.memory_space<vmem>>, vector<1x2x128xf32>
    %449 = vector.shape_cast %448 : vector<1x2x128xf32> to vector<2x128xf32>
    %450 = arith.truncf %435 : vector<2x32xf32> to vector<2x32xbf16>
    %c0_176 = arith.constant 0 : index
    %c0_177 = arith.constant 0 : index
    %451 = vector.load %arg7[%c0_176, %c0_177] : memref<32x128xbf16, #tpu.memory_space<vmem>>, vector<32x128xbf16>
    %cst_178 = arith.constant dense<0.000000e+00> : vector<2x128xf32>
    %452 = tpu.matmul %450, %451, %cst_178 {dimension_numbers = #tpu.dot_dimension_numbers<[1], [0], [0], [1], [0, 0, 1, 1], [], []>} : vector<2x32xbf16>, vector<32x128xbf16>, vector<2x128xf32> -> vector<2x128xf32>
    %453 = arith.addf %449, %452 : vector<2x128xf32>
    %454 = arith.index_cast %388 : i32 to index
    %c0_179 = arith.constant 0 : index
    %c0_180 = arith.constant 0 : index
    %455 = vector.load %arg12[%454, %c0_179, %c0_180] : memref<8x2x128xf32, #tpu.memory_space<vmem>>, vector<1x2x128xf32>
    %456 = vector.shape_cast %455 : vector<1x2x128xf32> to vector<2x128xf32>
    %457 = vector.shape_cast %453 : vector<2x128xf32> to vector<1x2x128xf32>
    tpu.vector_store %arg12[%454, %c0_179, %c0_180], %457 {strides = array<i32>} : memref<8x2x128xf32, #tpu.memory_space<vmem>>, vector<1x2x128xf32>,
    %458 = tpu.concatenate %419, %435 in 1 : vector<2x32xf32>, vector<2x32xf32> -> vector<2x64xf32>
    %c6_i32 = arith.constant 6 : i32
    %c7_i32_181 = arith.constant 7 : i32
    %459 = arith.subi %c7_i32_181, %c6_i32 : i32
    %460 = arith.truncf %458 : vector<2x64xf32> to vector<2x64xbf16>
    %c0_182 = arith.constant 0 : index
    %c0_183 = arith.constant 0 : index
    %461 = vector.load %arg5[%c0_182, %c0_183] : memref<64x256xbf16, #tpu.memory_space<vmem>>, vector<64x256xbf16>
    %cst_184 = arith.constant dense<0.000000e+00> : vector<2x256xf32>
    %462 = tpu.matmul %460, %461, %cst_184 {dimension_numbers = #tpu.dot_dimension_numbers<[1], [0], [0], [1], [0, 0, 1, 1], [], []>} : vector<2x64xbf16>, vector<64x256xbf16>, vector<2x256xf32> -> vector<2x256xf32>
    %463 = arith.index_cast %c6_i32 : i32 to index
    %c0_185 = arith.constant 0 : index
    %c0_186 = arith.constant 0 : index
    %464 = vector.load %arg10[%463, %c0_185, %c0_186] : memref<8x2x128xbf16, #tpu.memory_space<vmem>>, vector<1x2x128xbf16>
    %465 = vector.shape_cast %464 : vector<1x2x128xbf16> to vector<2x128xbf16>
    %466 = arith.extf %465 : vector<2x128xbf16> to vector<2x128xf32>
    %467 = vector.extract_strided_slice %462 {offsets = [0, 0], sizes = [2, 128], strides = [1, 1]} : vector<2x256xf32> to vector<2x128xf32>
    %468 = arith.addf %466, %467 : vector<2x128xf32>
    %469 = arith.index_cast %459 : i32 to index
    %c0_187 = arith.constant 0 : index
    %c0_188 = arith.constant 0 : index
    %470 = vector.load %arg11[%469, %c0_187, %c0_188] : memref<8x2x128xbf16, #tpu.memory_space<vmem>>, vector<1x2x128xbf16>
    %471 = vector.shape_cast %470 : vector<1x2x128xbf16> to vector<2x128xbf16>
    %472 = arith.extf %471 : vector<2x128xbf16> to vector<2x128xf32>
    %473 = vector.extract_strided_slice %462 {offsets = [0, 128], sizes = [2, 128], strides = [1, 1]} : vector<2x256xf32> to vector<2x128xf32>
    %474 = arith.addf %472, %473 : vector<2x128xf32>
    %475 = arith.mulf %468, %30 : vector<2x128xf32>
    %476 = math.tanh %475 : vector<2x128xf32>
    %cst_189 = arith.constant 1.000000e+00 : f32
    %477 = vector.broadcast %cst_189 : f32 to vector<2x128xf32>
    %478 = arith.addf %476, %477 : vector<2x128xf32>
    %cst_190 = arith.constant 5.000000e-01 : f32
    %479 = vector.broadcast %cst_190 : f32 to vector<2x128xf32>
    %480 = arith.mulf %479, %478 : vector<2x128xf32>
    %481 = arith.select %27, %476, %480 : vector<2x128xi1>, vector<2x128xf32>
    %482 = vector.extract_strided_slice %481 {offsets = [0, 0], sizes = [2, 32], strides = [1, 1]} : vector<2x128xf32> to vector<2x32xf32>
    %483 = vector.extract_strided_slice %481 {offsets = [0, 32], sizes = [2, 32], strides = [1, 1]} : vector<2x128xf32> to vector<2x32xf32>
    %484 = vector.extract_strided_slice %481 {offsets = [0, 64], sizes = [2, 32], strides = [1, 1]} : vector<2x128xf32> to vector<2x32xf32>
    %485 = vector.extract_strided_slice %481 {offsets = [0, 96], sizes = [2, 32], strides = [1, 1]} : vector<2x128xf32> to vector<2x32xf32>
    %486 = arith.mulf %483, %417 : vector<2x32xf32>
    %487 = arith.mulf %482, %484 : vector<2x32xf32>
    %488 = arith.addf %486, %487 : vector<2x32xf32>
    %489 = math.tanh %488 : vector<2x32xf32>
    %490 = arith.mulf %485, %489 : vector<2x32xf32>
    %491 = arith.mulf %474, %30 : vector<2x128xf32>
    %492 = math.tanh %491 : vector<2x128xf32>
    %cst_191 = arith.constant 1.000000e+00 : f32
    %493 = vector.broadcast %cst_191 : f32 to vector<2x128xf32>
    %494 = arith.addf %492, %493 : vector<2x128xf32>
    %cst_192 = arith.constant 5.000000e-01 : f32
    %495 = vector.broadcast %cst_192 : f32 to vector<2x128xf32>
    %496 = arith.mulf %495, %494 : vector<2x128xf32>
    %497 = arith.select %27, %492, %496 : vector<2x128xi1>, vector<2x128xf32>
    %498 = vector.extract_strided_slice %497 {offsets = [0, 0], sizes = [2, 32], strides = [1, 1]} : vector<2x128xf32> to vector<2x32xf32>
    %499 = vector.extract_strided_slice %497 {offsets = [0, 32], sizes = [2, 32], strides = [1, 1]} : vector<2x128xf32> to vector<2x32xf32>
    %500 = vector.extract_strided_slice %497 {offsets = [0, 64], sizes = [2, 32], strides = [1, 1]} : vector<2x128xf32> to vector<2x32xf32>
    %501 = vector.extract_strided_slice %497 {offsets = [0, 96], sizes = [2, 32], strides = [1, 1]} : vector<2x128xf32> to vector<2x32xf32>
    %502 = arith.mulf %499, %433 : vector<2x32xf32>
    %503 = arith.mulf %498, %500 : vector<2x32xf32>
    %504 = arith.addf %502, %503 : vector<2x32xf32>
    %505 = math.tanh %504 : vector<2x32xf32>
    %506 = arith.mulf %501, %505 : vector<2x32xf32>
    %507 = arith.index_cast %c6_i32 : i32 to index
    %c0_193 = arith.constant 0 : index
    %c0_194 = arith.constant 0 : index
    %508 = vector.load %arg12[%507, %c0_193, %c0_194] : memref<8x2x128xf32, #tpu.memory_space<vmem>>, vector<1x2x128xf32>
    %509 = vector.shape_cast %508 : vector<1x2x128xf32> to vector<2x128xf32>
    %510 = arith.truncf %490 : vector<2x32xf32> to vector<2x32xbf16>
    %c0_195 = arith.constant 0 : index
    %c0_196 = arith.constant 0 : index
    %511 = vector.load %arg6[%c0_195, %c0_196] : memref<32x128xbf16, #tpu.memory_space<vmem>>, vector<32x128xbf16>
    %cst_197 = arith.constant dense<0.000000e+00> : vector<2x128xf32>
    %512 = tpu.matmul %510, %511, %cst_197 {dimension_numbers = #tpu.dot_dimension_numbers<[1], [0], [0], [1], [0, 0, 1, 1], [], []>} : vector<2x32xbf16>, vector<32x128xbf16>, vector<2x128xf32> -> vector<2x128xf32>
    %513 = arith.addf %509, %512 : vector<2x128xf32>
    %514 = arith.index_cast %c6_i32 : i32 to index
    %c0_198 = arith.constant 0 : index
    %c0_199 = arith.constant 0 : index
    %515 = vector.load %arg12[%514, %c0_198, %c0_199] : memref<8x2x128xf32, #tpu.memory_space<vmem>>, vector<1x2x128xf32>
    %516 = vector.shape_cast %515 : vector<1x2x128xf32> to vector<2x128xf32>
    %517 = vector.shape_cast %513 : vector<2x128xf32> to vector<1x2x128xf32>
    tpu.vector_store %arg12[%514, %c0_198, %c0_199], %517 {strides = array<i32>} : memref<8x2x128xf32, #tpu.memory_space<vmem>>, vector<1x2x128xf32>,
    %518 = arith.index_cast %459 : i32 to index
    %c0_200 = arith.constant 0 : index
    %c0_201 = arith.constant 0 : index
    %519 = vector.load %arg12[%518, %c0_200, %c0_201] : memref<8x2x128xf32, #tpu.memory_space<vmem>>, vector<1x2x128xf32>
    %520 = vector.shape_cast %519 : vector<1x2x128xf32> to vector<2x128xf32>
    %521 = arith.truncf %506 : vector<2x32xf32> to vector<2x32xbf16>
    %c0_202 = arith.constant 0 : index
    %c0_203 = arith.constant 0 : index
    %522 = vector.load %arg7[%c0_202, %c0_203] : memref<32x128xbf16, #tpu.memory_space<vmem>>, vector<32x128xbf16>
    %cst_204 = arith.constant dense<0.000000e+00> : vector<2x128xf32>
    %523 = tpu.matmul %521, %522, %cst_204 {dimension_numbers = #tpu.dot_dimension_numbers<[1], [0], [0], [1], [0, 0, 1, 1], [], []>} : vector<2x32xbf16>, vector<32x128xbf16>, vector<2x128xf32> -> vector<2x128xf32>
    %524 = arith.addf %520, %523 : vector<2x128xf32>
    %525 = arith.index_cast %459 : i32 to index
    %c0_205 = arith.constant 0 : index
    %c0_206 = arith.constant 0 : index
    %526 = vector.load %arg12[%525, %c0_205, %c0_206] : memref<8x2x128xf32, #tpu.memory_space<vmem>>, vector<1x2x128xf32>
    %527 = vector.shape_cast %526 : vector<1x2x128xf32> to vector<2x128xf32>
    %528 = vector.shape_cast %524 : vector<2x128xf32> to vector<1x2x128xf32>
    tpu.vector_store %arg12[%525, %c0_205, %c0_206], %528 {strides = array<i32>} : memref<8x2x128xf32, #tpu.memory_space<vmem>>, vector<1x2x128xf32>,
    %529 = tpu.concatenate %490, %506 in 1 : vector<2x32xf32>, vector<2x32xf32> -> vector<2x64xf32>
    %c7_i32_207 = arith.constant 7 : i32
    %c7_i32_208 = arith.constant 7 : i32
    %530 = arith.subi %c7_i32_208, %c7_i32_207 : i32
    %531 = arith.truncf %529 : vector<2x64xf32> to vector<2x64xbf16>
    %c0_209 = arith.constant 0 : index
    %c0_210 = arith.constant 0 : index
    %532 = vector.load %arg5[%c0_209, %c0_210] : memref<64x256xbf16, #tpu.memory_space<vmem>>, vector<64x256xbf16>
    %cst_211 = arith.constant dense<0.000000e+00> : vector<2x256xf32>
    %533 = tpu.matmul %531, %532, %cst_211 {dimension_numbers = #tpu.dot_dimension_numbers<[1], [0], [0], [1], [0, 0, 1, 1], [], []>} : vector<2x64xbf16>, vector<64x256xbf16>, vector<2x256xf32> -> vector<2x256xf32>
    %534 = arith.index_cast %c7_i32_207 : i32 to index
    %c0_212 = arith.constant 0 : index
    %c0_213 = arith.constant 0 : index
    %535 = vector.load %arg10[%534, %c0_212, %c0_213] : memref<8x2x128xbf16, #tpu.memory_space<vmem>>, vector<1x2x128xbf16>
    %536 = vector.shape_cast %535 : vector<1x2x128xbf16> to vector<2x128xbf16>
    %537 = arith.extf %536 : vector<2x128xbf16> to vector<2x128xf32>
    %538 = vector.extract_strided_slice %533 {offsets = [0, 0], sizes = [2, 128], strides = [1, 1]} : vector<2x256xf32> to vector<2x128xf32>
    %539 = arith.addf %537, %538 : vector<2x128xf32>
    %540 = arith.index_cast %530 : i32 to index
    %c0_214 = arith.constant 0 : index
    %c0_215 = arith.constant 0 : index
    %541 = vector.load %arg11[%540, %c0_214, %c0_215] : memref<8x2x128xbf16, #tpu.memory_space<vmem>>, vector<1x2x128xbf16>
    %542 = vector.shape_cast %541 : vector<1x2x128xbf16> to vector<2x128xbf16>
    %543 = arith.extf %542 : vector<2x128xbf16> to vector<2x128xf32>
    %544 = vector.extract_strided_slice %533 {offsets = [0, 128], sizes = [2, 128], strides = [1, 1]} : vector<2x256xf32> to vector<2x128xf32>
    %545 = arith.addf %543, %544 : vector<2x128xf32>
    %546 = arith.mulf %539, %30 : vector<2x128xf32>
    %547 = math.tanh %546 : vector<2x128xf32>
    %cst_216 = arith.constant 1.000000e+00 : f32
    %548 = vector.broadcast %cst_216 : f32 to vector<2x128xf32>
    %549 = arith.addf %547, %548 : vector<2x128xf32>
    %cst_217 = arith.constant 5.000000e-01 : f32
    %550 = vector.broadcast %cst_217 : f32 to vector<2x128xf32>
    %551 = arith.mulf %550, %549 : vector<2x128xf32>
    %552 = arith.select %27, %547, %551 : vector<2x128xi1>, vector<2x128xf32>
    %553 = vector.extract_strided_slice %552 {offsets = [0, 0], sizes = [2, 32], strides = [1, 1]} : vector<2x128xf32> to vector<2x32xf32>
    %554 = vector.extract_strided_slice %552 {offsets = [0, 32], sizes = [2, 32], strides = [1, 1]} : vector<2x128xf32> to vector<2x32xf32>
    %555 = vector.extract_strided_slice %552 {offsets = [0, 64], sizes = [2, 32], strides = [1, 1]} : vector<2x128xf32> to vector<2x32xf32>
    %556 = vector.extract_strided_slice %552 {offsets = [0, 96], sizes = [2, 32], strides = [1, 1]} : vector<2x128xf32> to vector<2x32xf32>
    %557 = arith.mulf %554, %488 : vector<2x32xf32>
    %558 = arith.mulf %553, %555 : vector<2x32xf32>
    %559 = arith.addf %557, %558 : vector<2x32xf32>
    %560 = math.tanh %559 : vector<2x32xf32>
    %561 = arith.mulf %556, %560 : vector<2x32xf32>
    %562 = arith.mulf %545, %30 : vector<2x128xf32>
    %563 = math.tanh %562 : vector<2x128xf32>
    %cst_218 = arith.constant 1.000000e+00 : f32
    %564 = vector.broadcast %cst_218 : f32 to vector<2x128xf32>
    %565 = arith.addf %563, %564 : vector<2x128xf32>
    %cst_219 = arith.constant 5.000000e-01 : f32
    %566 = vector.broadcast %cst_219 : f32 to vector<2x128xf32>
    %567 = arith.mulf %566, %565 : vector<2x128xf32>
    %568 = arith.select %27, %563, %567 : vector<2x128xi1>, vector<2x128xf32>
    %569 = vector.extract_strided_slice %568 {offsets = [0, 0], sizes = [2, 32], strides = [1, 1]} : vector<2x128xf32> to vector<2x32xf32>
    %570 = vector.extract_strided_slice %568 {offsets = [0, 32], sizes = [2, 32], strides = [1, 1]} : vector<2x128xf32> to vector<2x32xf32>
    %571 = vector.extract_strided_slice %568 {offsets = [0, 64], sizes = [2, 32], strides = [1, 1]} : vector<2x128xf32> to vector<2x32xf32>
    %572 = vector.extract_strided_slice %568 {offsets = [0, 96], sizes = [2, 32], strides = [1, 1]} : vector<2x128xf32> to vector<2x32xf32>
    %573 = arith.mulf %570, %504 : vector<2x32xf32>
    %574 = arith.mulf %569, %571 : vector<2x32xf32>
    %575 = arith.addf %573, %574 : vector<2x32xf32>
    %576 = math.tanh %575 : vector<2x32xf32>
    %577 = arith.mulf %572, %576 : vector<2x32xf32>
    %578 = arith.index_cast %c7_i32_207 : i32 to index
    %c0_220 = arith.constant 0 : index
    %c0_221 = arith.constant 0 : index
    %579 = vector.load %arg12[%578, %c0_220, %c0_221] : memref<8x2x128xf32, #tpu.memory_space<vmem>>, vector<1x2x128xf32>
    %580 = vector.shape_cast %579 : vector<1x2x128xf32> to vector<2x128xf32>
    %581 = arith.truncf %561 : vector<2x32xf32> to vector<2x32xbf16>
    %c0_222 = arith.constant 0 : index
    %c0_223 = arith.constant 0 : index
    %582 = vector.load %arg6[%c0_222, %c0_223] : memref<32x128xbf16, #tpu.memory_space<vmem>>, vector<32x128xbf16>
    %cst_224 = arith.constant dense<0.000000e+00> : vector<2x128xf32>
    %583 = tpu.matmul %581, %582, %cst_224 {dimension_numbers = #tpu.dot_dimension_numbers<[1], [0], [0], [1], [0, 0, 1, 1], [], []>} : vector<2x32xbf16>, vector<32x128xbf16>, vector<2x128xf32> -> vector<2x128xf32>
    %584 = arith.addf %580, %583 : vector<2x128xf32>
    %585 = arith.index_cast %c7_i32_207 : i32 to index
    %c0_225 = arith.constant 0 : index
    %c0_226 = arith.constant 0 : index
    %586 = vector.load %arg12[%585, %c0_225, %c0_226] : memref<8x2x128xf32, #tpu.memory_space<vmem>>, vector<1x2x128xf32>
    %587 = vector.shape_cast %586 : vector<1x2x128xf32> to vector<2x128xf32>
    %588 = vector.shape_cast %584 : vector<2x128xf32> to vector<1x2x128xf32>
    tpu.vector_store %arg12[%585, %c0_225, %c0_226], %588 {strides = array<i32>} : memref<8x2x128xf32, #tpu.memory_space<vmem>>, vector<1x2x128xf32>,
    %589 = arith.index_cast %530 : i32 to index
    %c0_227 = arith.constant 0 : index
    %c0_228 = arith.constant 0 : index
    %590 = vector.load %arg12[%589, %c0_227, %c0_228] : memref<8x2x128xf32, #tpu.memory_space<vmem>>, vector<1x2x128xf32>
    %591 = vector.shape_cast %590 : vector<1x2x128xf32> to vector<2x128xf32>
    %592 = arith.truncf %577 : vector<2x32xf32> to vector<2x32xbf16>
    %c0_229 = arith.constant 0 : index
    %c0_230 = arith.constant 0 : index
    %593 = vector.load %arg7[%c0_229, %c0_230] : memref<32x128xbf16, #tpu.memory_space<vmem>>, vector<32x128xbf16>
    %cst_231 = arith.constant dense<0.000000e+00> : vector<2x128xf32>
    %594 = tpu.matmul %592, %593, %cst_231 {dimension_numbers = #tpu.dot_dimension_numbers<[1], [0], [0], [1], [0, 0, 1, 1], [], []>} : vector<2x32xbf16>, vector<32x128xbf16>, vector<2x128xf32> -> vector<2x128xf32>
    %595 = arith.addf %591, %594 : vector<2x128xf32>
    %596 = arith.index_cast %530 : i32 to index
    %c0_232 = arith.constant 0 : index
    %c0_233 = arith.constant 0 : index
    %597 = vector.load %arg12[%596, %c0_232, %c0_233] : memref<8x2x128xf32, #tpu.memory_space<vmem>>, vector<1x2x128xf32>
    %598 = vector.shape_cast %597 : vector<1x2x128xf32> to vector<2x128xf32>
    %599 = vector.shape_cast %595 : vector<2x128xf32> to vector<1x2x128xf32>
    tpu.vector_store %arg12[%596, %c0_232, %c0_233], %599 {strides = array<i32>} : memref<8x2x128xf32, #tpu.memory_space<vmem>>, vector<1x2x128xf32>,
    %600 = tpu.concatenate %561, %577 in 1 : vector<2x32xf32>, vector<2x32xf32> -> vector<2x64xf32>
    %c8_i32 = arith.constant 8 : i32
    %c0_234 = arith.constant 0 : index
    %c0_235 = arith.constant 0 : index
    %c0_236 = arith.constant 0 : index
    %601 = vector.load %arg12[%c0_234, %c0_235, %c0_236] : memref<8x2x128xf32, #tpu.memory_space<vmem>>, vector<8x2x4xf32>
    %c0_237 = arith.constant 0 : index
    %c0_238 = arith.constant 0 : index
    %c0_239 = arith.constant 0 : index
    %602 = vector.load %arg9[%c0_237, %c0_238, %c0_239] : memref<8x2x4xf32, #tpu.memory_space<vmem>>, vector<8x2x4xf32>
    tpu.vector_store %arg9[%c0_237, %c0_238, %c0_239], %601 {strides = array<i32>} : memref<8x2x4xf32, #tpu.memory_space<vmem>>, vector<8x2x4xf32>,
    return
  }
}

</mosaic_0001>

<bundles_post_ra>
// kernel: tpu_custom_call.1
= control target key start
LH: loop header
LB: loop body
LE: loop exit
PB: predicated region body
PF: predicated region fallthrough
CT: control target
= control target key end

     0   :  { %14 = vsyncpa [#allocation6], 0  ;;  %s3296_s0 = inlined_call_operand.hbm [shape: bf16[8,2,32], index: 0, kind: input, shape index: {}]   ;;  %s3297_s1 = inlined_call_operand.hbm [shape: bf16[32,128], index: 1, kind: input, shape index: {}]   ;;  %s3298_s2 = inlined_call_operand.hbm [shape: bf16[32,128], index: 2, kind: input, shape index: {}]   ;;  %s3299_s3 = inlined_call_operand.vmem [shape: f32[1,128], index: 3, kind: input, shape index: {}]   ;;  %s3300_s4 = inlined_call_operand.vmem [shape: f32[1,128], index: 4, kind: input, shape index: {}]   ;;  %s3301_s5 = inlined_call_operand.hbm [shape: bf16[64,256], index: 5, kind: input, shape index: {}]   ;;  %s3302_s6 = inlined_call_operand.hbm [shape: bf16[32,128], index: 6, kind: input, shape index: {}]   ;;  %s3303_s7 = inlined_call_operand.hbm [shape: bf16[32,128], index: 7, kind: input, shape index: {}]   ;;  %s3304_s8 = inlined_call_operand.vmem [shape: f32[1,128], index: 8, kind: input, shape index: {}]   ;;  %s3305_s9 = inlined_call_operand.vmem [shape: f32[8,2,4], index: 9, kind: output, shape index: {}]  }
   0x1   :  { %15 = vsyncpa [#allocation8], 0 }
   0x2   :  { %16 = vsyncpa [#allocation11], 0  ;;  %s35_s11 = sshll.u32 %s3297_s1, 4  ;;  %s36_s11 = int_to_ptr.hbm [resolvable:$true] %s35_s11 }
   0x3   :  { %17 = vsyncpa [#allocation14], 0  ;;  %s2849_s12 = smov [#allocation7]   ;;  %s65_s16 = sshll.u32 %s3301_s5, 4  ;;  %s66_s16 = int_to_ptr.hbm [resolvable:$true] %s65_s16 }
   0x4   :  { %s37_s13 = sshll.u32 %s2849_s12, 4  ;;  %s2850_s17 = smov 64   ;;  %s38_s13 = int_to_ptr.vmem [resolvable:$true] %s37_s13 }
   0x5   :  { %s2851_s18 = smov 4   ;;  %s2852_s19 = smov [#allocation10]  }
   0x6   :  { %43 = dma.hbm_to_vmem [thread:$0]  %s36_s11, 256, %s38_s13, [#allocation8], %s2850_s17, %s2850_s17, %s2851_s18  }
   0x7   :  { %s67_s20 = sshll.u32 %s2852_s19, 4  ;;  %s2853_s1 = smov 128   ;;  %s68_s20 = int_to_ptr.vmem [resolvable:$true] %s67_s20 }
   0x8   :  { %s2854_s21 = smov 8   ;;  %s22_s24 = sshll.u32 %s3296_s0, 4  ;;  %s23_s24 = int_to_ptr.hbm [resolvable:$true] %s22_s24 }
   0x9   :  { %73 = dma.hbm_to_vmem [thread:$0]  %s66_s16, 1024, %s68_s20, [#allocation11], %s2853_s1, %s2853_s1, %s2854_s21  }
   0xa   :  { %s2855_s25 = smov [#allocation5]   ;;  %s48_s28 = sshll.u32 %s3298_s2, 4  ;;  %s49_s28 = int_to_ptr.hbm [resolvable:$true] %s48_s28 }
   0xb   :  { %s24_s5 = sshll.u32 %s2855_s25, 4  ;;  %s2856_s29 = smov 16   ;;  %s25_s5 = int_to_ptr.vmem [resolvable:$true] %s24_s5 }
   0xc   :  { %s2857_s30 = smov 1   ;;  %s2858_s10 = smov [#allocation9]  }
   0xd   :  { %30 = dma.hbm_to_vmem [thread:$0]  %s23_s24, 128, %s25_s5, [#allocation6], %s2856_s29, %s2856_s29, %s2857_s30  }
   0xe   :  { %s50_s11 = sshll.u32 %s2858_s10, 4  ;;  %s78_s14 = sshll.u32 %s3302_s6, 4  ;;  %s51_s11 = int_to_ptr.vmem [resolvable:$true] %s50_s11  ;;  %s79_s14 = int_to_ptr.hbm [resolvable:$true] %s78_s14 }
   0xf   :  { %56 = dma.hbm_to_vmem [thread:$0]  %s49_s28, 256, %s51_s11, [#allocation8], %s2850_s17, %s2850_s17, %s2851_s18  }
  0x10   :  { %s91_s2 = sshll.u32 %s3303_s7, 4  ;;  %s2859_s16 = smov [#allocation12]   ;;  %s92_s2 = int_to_ptr.hbm [resolvable:$true] %s91_s2 }
  0x11   :  { %s80_s19 = sshll.u32 %s2859_s16, 4  ;;  %s2860_s20 = smov [#allocation13]   ;;  %s81_s19 = int_to_ptr.vmem [resolvable:$true] %s80_s19 }
  0x12   :  { %86 = dma.hbm_to_vmem [thread:$0]  %s79_s14, 256, %s81_s19, [#allocation11], %s2850_s17, %s2850_s17, %s2851_s18  }
  0x13   :  { %s93_s6 = sshll.u32 %s2860_s20, 4  ;;  %s94_s6 = int_to_ptr.vmem [resolvable:$true] %s93_s6 }
  0x14   :  { %99 = dma.hbm_to_vmem [thread:$0]  %s92_s2, 256, %s94_s6, [#allocation14], %s2850_s17, %s2850_s17, %s2851_s18  }
  0x15   :  { %2841 = dma.done.wait [#allocation6], 128  }
  0x16   :  { %2842 = vsyncadd [#allocation6], 4294967168 }
  0x17   :  { %2843 = dma.done.wait [#allocation8], 512  }
  0x18   :  { %2844 = vsyncadd [#allocation8], 4294966784 }
  0x19   :  { %2845 = dma.done.wait [#allocation11], 1280  }
  0x1a   :  { %2846 = vsyncadd [#allocation11], 4294966016 }
  0x1b   :  { %2847 = dma.done.wait [#allocation14], 256  }
  0x1c   :  { %2848 = vsyncadd [#allocation14], 4294967040  ;;  %v2516_v0 = vld [vmem:[#allocation7 + $0x8] sm:$0xff]  ;;  %v2127_v1 = vld [vmem:[#allocation10 + $0x30] sm:$0xf]  ;;  %vm179_vm0 = vcmask 261120   ;;  %v320_v41 = vlaneseq }
  0x1d   :  { %v2526_v2 = vld [vmem:[#allocation10 + $0x34] sm:$0xf0]  ;;  %v2119_v4 = vld [vmem:[#allocation10 + $0x20] sm:$0xf]  ;;  %v2524_v5 = vld [vmem:[#allocation10 + $0x24] sm:$0xf0]  ;;  %188 = vmatpush.bf16.msra.mxu0 %v2516_v0 }
  0x1e   :  { %v2128_v3 = vor.u32 %v2526_v2, %v2127_v1  ;;  %v2515_v6 = vld [vmem:[#allocation7] sm:$0xff]  ;;  %v127_v7 = vld [vmem:[#allocation5] sm:$0x1]  ;;  %v128_v8 = vld [vmem:[#allocation5 + $0x1] sm:$0x1]  ;;  %v2120_v9 = vor.u32 %v2524_v5, %v2119_v4  ;;  %v2861_v36 = vmov 0  }
  0x1f   :  { %v129_v10 = vld [vmem:[#allocation5 + $0x2] sm:$0x1]  ;;  %v130_v11 = vld [vmem:[#allocation5 + $0x3] sm:$0x1]  ;;  %v131_v12 = vld [vmem:[#allocation5 + $0x4] sm:$0x1] }
  0x20   :  { %382 = vmatpush.bf16.msra.mxu2 %v2128_v3  ;;  %v132_v13 = vld [vmem:[#allocation5 + $0x5] sm:$0x1]  ;;  %144 = vst [vmem:[#allocation1] ss:$9 sm:$0xff] %v127_v7  ;;  %v133_v14 = vld [vmem:[#allocation5 + $0x6] sm:$0x1] }
  0x21   :  { %147 = vst [vmem:[#allocation1 + $0x1] ss:$9 sm:$0xff] %v128_v8  ;;  %v2518_v15 = vld [vmem:[#allocation9 + $0x8] sm:$0xff]  ;;  %v2111_v16 = vld [vmem:[#allocation10 + $0x10] sm:$0xf]  ;;  %189 = vmatpush.bf16.msra.mxu0 %v2515_v6  ;;  %v321_v47 = vand.u32 127, %v320_v41 }
  0x22   :  { %v2517_v17 = vld [vmem:[#allocation9] sm:$0xff]  ;;  %v134_v18 = vld [vmem:[#allocation5 + $0x7] sm:$0x1]  ;;  %150 = vst [vmem:[#allocation1 + $0x2] ss:$9 sm:$0xff] %v129_v10  ;;  %240 = vmatpush.bf16.msra.mxu1 %v2518_v15  ;;  %v2862_v3 = vmov 0.5  }
  0x23   :  { %v2522_v19 = vld [vmem:[#allocation10 + $0x14] sm:$0xf0]  ;;  %v2525_v20 = vld [vmem:[#allocation10 + $0x34] sm:$0xf]  ;;  %153 = vst [vmem:[#allocation1 + $0x3] ss:$9 sm:$0xff] %v130_v11 }
  0x24   :  { %383 = vmatpush.bf16.msra.mxu2 %v2120_v9  ;;  %v2112_v21 = vor.u32 %v2522_v19, %v2111_v16  ;;  %v2129_v22 = vld [vmem:[#allocation10 + $0x38] sm:$0xf0]  ;;  %v2103_v23 = vld [vmem:[#allocation10] sm:$0xf]  ;;  %156 = vst [vmem:[#allocation1 + $0x4] ss:$9 sm:$0xff] %v131_v12 }
  0x25   :  { %v2132_v24 = vor.u32 %v2525_v20, %v2129_v22  ;;  %v2520_v25 = vld [vmem:[#allocation10 + $0x4] sm:$0xf0]  ;;  %v2523_v26 = vld [vmem:[#allocation10 + $0x24] sm:$0xf]  ;;  %159 = vst [vmem:[#allocation1 + $0x5] ss:$9 sm:$0xff] %v132_v13 }
  0x26   :  { %v2121_v27 = vld [vmem:[#allocation10 + $0x28] sm:$0xf0]  ;;  %162 = vst [vmem:[#allocation1 + $0x6] ss:$9 sm:$0xff] %v133_v14  ;;  %241 = vmatpush.bf16.msra.mxu1 %v2517_v17  ;;  %v2104_v29 = vor.u32 %v2520_v25, %v2103_v23  ;;  %v2521_v30 = vld [vmem:[#allocation10 + $0x14] sm:$0xf] }
  0x27   :  { %395 = vmatpush.bf16.msra.mxu3 %v2132_v24  ;;  %v2124_v28 = vor.u32 %v2523_v26, %v2121_v27  ;;  %165 = vst [vmem:[#allocation1 + $0x7] ss:$9 sm:$0xff] %v134_v18  ;;  %v2113_v31 = vld [vmem:[#allocation10 + $0x18] sm:$0xf0]  ;;  %v2519_v33 = vld [vmem:[#allocation10 + $0x4] sm:$0xf] }
  0x28   :  { %384 = vmatpush.bf16.msra.mxu2 %v2112_v21  ;;  %v2116_v32 = vor.u32 %v2521_v30, %v2113_v31  ;;  %v2105_v34 = vld [vmem:[#allocation10 + $0x8] sm:$0xf0]  ;;  %v2630_v39 = vld [vmem:[%s3299_s3] ss:$0 sm:$0xff]  ;;  %vm322_vm1 = vcmp.ge.s32.totalorder %v321_v47, 64  ;;  %vm323_vm2 = vcmp.lt.s32.totalorder %v321_v47, 96 }
  0x29   :  { %v2108_v37 = vor.u32 %v2519_v33, %v2105_v34  ;;  %vm2949_vm3 = vmand %vm322_vm1, %vm323_vm2  ;;  %v2631_v59 = vld [vmem:[%s3300_s4] ss:$0 sm:$0xff]  ;;  %s2863_s4 = smov 32   ;;  %vm374_vm4 = vcmask 523264   ;;  %vm2066_vm5 = vcmask 25600  }
  0x2a   :  { %v2958_v4 = vsel %vm2949_vm3, 1.0, %v2862_v3  ;;  %v2533_v3 = vld [vmem:[#allocation10 + $0x14] sm:$0xf] }
  0x2b   :  { %396 = vmatpush.bf16.msra.mxu3 %v2124_v28  ;;  %v2529_v58 = vld [vmem:[#allocation13] sm:$0xff] }
  0x2c   :  { %385 = vmatpush.bf16.msra.mxu2 %v2104_v29 }
  0x2e   :  { %v166_v35 = vld [vmem:[#allocation1] sm:$0xff] }
  0x2f   :  { %386 = vmatmul.bf16.vlgmr.msra.gmra.mxu2 %v2861_v36  ;;  %397 = vmatpush.bf16.msra.mxu3 %v2116_v32  ;;  %204 = vst [vmem:[#allocation1] ss:$9 sm:$0xff] %v127_v7 }
  0x30   :  { %2091 = vmatmul.msk.bf16.vlgmr.msra.gmra.mxu0 %vm179_vm0, %v166_v35  ;;  %206 = vst [vmem:[#allocation1 + $0x1] ss:$9 sm:$0xff] %v128_v8 }
  0x31   :  { %208 = vst [vmem:[#allocation1 + $0x2] ss:$9 sm:$0xff] %v129_v10 }
  0x32   :  { %210 = vst [vmem:[#allocation1 + $0x3] ss:$9 sm:$0xff] %v130_v11 }
  0x33   :  { %398 = vmatpush.bf16.msra.mxu3 %v2108_v37  ;;  %212 = vst [vmem:[#allocation1 + $0x4] ss:$9 sm:$0xff] %v131_v12 }
  0x34   :  { %214 = vst [vmem:[#allocation1 + $0x5] ss:$9 sm:$0xff] %v132_v13 }
  0x35   :  { %216 = vst [vmem:[#allocation1 + $0x6] ss:$9 sm:$0xff] %v133_v14 }
  0x36   :  { %399 = vmatmul.bf16.vlgmr.msra.gmra.mxu3 %v2861_v36  ;;  %218 = vst [vmem:[#allocation1 + $0x7] ss:$9 sm:$0xff] %v134_v18 }
  0x3d   :  { %v219_v38 = vld [vmem:[#allocation1] sm:$0xff] }
  0x3e   :  { %2100 = vmatmul.msk.bf16.vlgmr.msra.gmra.mxu1 %vm179_vm0, %v219_v38 }
  0xad   :  { %v191_v40 = vpop.f32.mrf.mxu0 }
  0xae   :  { %v192_v42 = vadd.f32 %v2630_v39, %v191_v40 }
  0xb0   :  { %v250_v43 = vrot.slane %v192_v42, 2  ;;  %v251_v44 = vrot.slane %v192_v42, 4  ;;  %v252_v45 = vrot.slane %v192_v42, 6  ;;  %v262_v46 = vpack.c.bf16 %v192_v42, %v192_v42 }
  0xb2   :  { %v263_v48 = vpack.c.bf16 %v250_v43, %v250_v43  ;;  %v264_v49 = vpack.c.bf16 %v251_v44, %v251_v44  ;;  %v265_v50 = vpack.c.bf16 %v252_v45, %v252_v45  ;;  %270 = vst [vmem:[#allocation2] sm:$0x1] %v262_v46  ;;  %v387_v51 = vpop.f32.mrf.mxu2 }
  0xb4   :  { %271 = vst [vmem:[#allocation2 + $0x1] sm:$0x1] %v263_v48 }
  0xb5   :  { %272 = vst [vmem:[#allocation2 + $0x2] sm:$0x1] %v264_v49  ;;  %v193_v52 = vpop.f32.mrf.mxu0 }
  0xb6   :  { %273 = vst [vmem:[#allocation2 + $0x3] sm:$0x1] %v265_v50  ;;  %v194_v53 = vadd.f32 %v2630_v39, %v193_v52 }
  0xb8   :  { %v253_v54 = vrot.slane %v194_v53, 2  ;;  %v254_v55 = vrot.slane %v194_v53, 4  ;;  %v255_v56 = vrot.slane %v194_v53, 6  ;;  %v266_v57 = vpack.c.bf16 %v194_v53, %v194_v53 }
  0xb9   :  { %v404_v60 = vld [vmem:[#allocation2] sm:$0x1]  ;;  %v400_v61 = vpop.f32.mrf.mxu3 }
  0xba   :  { %v267_v62 = vpack.c.bf16 %v253_v54, %v253_v54  ;;  %v268_v63 = vpack.c.bf16 %v254_v55, %v254_v55  ;;  %v269_v0 = vpack.c.bf16 %v255_v56, %v255_v56  ;;  %274 = vst [vmem:[#allocation2 + $0x4] sm:$0x1] %v266_v57  ;;  %v405_v1 = vunpack.c.l.bf16 %v404_v60  ;;  %v389_v2 = vpop.f32.mrf.mxu2  ;;  %v2537_v54 = vld [vmem:[#allocation10 + $0x34] sm:$0xf]  ;;  %v2179_v55 = vld [vmem:[#allocation10 + $0x38] sm:$0xf0] }
  0xbb   :  { %v243_v5 = vpop.f32.mrf.mxu1  ;;  %v2177_v56 = vld [vmem:[#allocation10 + $0x30] sm:$0xf]  ;;  %v2182_v57 = vor.u32 %v2537_v54, %v2179_v55  ;;  %v2535_v60 = vld [vmem:[#allocation10 + $0x24] sm:$0xf] }
  0xbc   :  { %275 = vst [vmem:[#allocation2 + $0x5] sm:$0x1] %v267_v62  ;;  %v406_v6 = vadd.f32 %v405_v1, %v387_v51  ;;  %v244_v7 = vadd.f32 %v2631_v59, %v243_v5  ;;  %v2163_v5 = vld [vmem:[#allocation10 + $0x18] sm:$0xf0] }
  0xbd   :  { %276 = vst [vmem:[#allocation2 + $0x6] sm:$0x1] %v268_v63  ;;  %v2169_v63 = vld [vmem:[#allocation10 + $0x20] sm:$0xf]  ;;  %612 = vmatpush.bf16.msrb.mxu3 %v2182_v57 }
  0xbe   :  { %277 = vst [vmem:[#allocation2 + $0x7] sm:$0x1] %v269_v0  ;;  %v411_v8 = vmul.f32 %v406_v6, %v2958_v4  ;;  %v280_v9 = vrot.slane %v244_v7, 2  ;;  %v281_v10 = vrot.slane %v244_v7, 4  ;;  %v282_v11 = vrot.slane %v244_v7, 6 }
  0xbf   :  { %v292_v12 = vpack.c.bf16 %v244_v7, %v244_v7  ;;  %v2536_v0 = vld [vmem:[#allocation10 + $0x24] sm:$0xf0]  ;;  %v2161_v6 = vld [vmem:[#allocation10 + $0x10] sm:$0xf]  ;;  %v2534_v7 = vld [vmem:[#allocation10 + $0x14] sm:$0xf0] }
  0xc0   :  { %2633 = vtanh.f32 %v411_v8  ;;  %v293_v13 = vpack.c.bf16 %v280_v9, %v280_v9  ;;  %v294_v14 = vpack.c.bf16 %v281_v10, %v281_v10  ;;  %v295_v15 = vpack.c.bf16 %v282_v11, %v282_v11  ;;  %v2531_v10 = vld [vmem:[#allocation10 + $0x4] sm:$0xf]  ;;  %v2155_v11 = vld [vmem:[#allocation10 + $0x8] sm:$0xf0] }
  0xc1   :  { %300 = vst [vmem:[#allocation3] sm:$0x1] %v292_v12  ;;  %v402_v16 = vpop.f32.mrf.mxu3  ;;  %v2170_v2 = vor.u32 %v2536_v0, %v2169_v63  ;;  %v2166_v8 = vor.u32 %v2533_v3, %v2163_v5  ;;  %v2162_v9 = vor.u32 %v2534_v7, %v2161_v6  ;;  %v2158_v12 = vor.u32 %v2531_v10, %v2155_v11  ;;  %v2231_v63 = vld [vmem:[#allocation10 + $0x38] sm:$0xf0]  ;;  %v2221_v0 = vld [vmem:[#allocation10 + $0x20] sm:$0xf] }
  0xc2   :  { %301 = vst [vmem:[#allocation3 + $0x1] sm:$0x1] %v293_v13  ;;  %v2153_v13 = vld [vmem:[#allocation10] sm:$0xf]  ;;  %v2547_v3 = vld [vmem:[#allocation10 + $0x24] sm:$0xf] }
  0xc3   :  { %302 = vst [vmem:[#allocation3 + $0x2] sm:$0x1] %v294_v14  ;;  %v245_v17 = vpop.f32.mrf.mxu1  ;;  %v2532_v14 = vld [vmem:[#allocation10 + $0x4] sm:$0xf0]  ;;  %v2223_v5 = vld [vmem:[#allocation10 + $0x28] sm:$0xf0] }
  0xc4   :  { %303 = vst [vmem:[#allocation3 + $0x3] sm:$0x1] %v295_v15  ;;  %v246_v18 = vadd.f32 %v2631_v59, %v245_v17  ;;  %v2538_v59 = vld [vmem:[#allocation10 + $0x34] sm:$0xf0]  ;;  %v2154_v15 = vor.u32 %v2532_v14, %v2153_v13  ;;  %v2226_v7 = vor.u32 %v2547_v3, %v2223_v5  ;;  %v2545_v10 = vld [vmem:[#allocation10 + $0x14] sm:$0xf] }
  0xc5   :  { %v2178_v62 = vor.u32 %v2538_v59, %v2177_v56  ;;  %v2229_v59 = vld [vmem:[#allocation10 + $0x30] sm:$0xf]  ;;  %v2215_v11 = vld [vmem:[#allocation10 + $0x18] sm:$0xf0]  ;;  %v2205_v14 = vld [vmem:[#allocation10] sm:$0xf] }
  0xc6   :  { %v2634_v19 = vpop.eup %2633  ;;  %v283_v20 = vrot.slane %v246_v18, 2  ;;  %v284_v21 = vrot.slane %v246_v18, 4  ;;  %v285_v22 = vrot.slane %v246_v18, 6  ;;  %v296_v23 = vpack.c.bf16 %v246_v18, %v246_v18  ;;  %v2561_v3 = vld [vmem:[#allocation10 + $0x34] sm:$0xf] }
  0xc7   :  { %v413_v24 = vadd.f32 1.0, %v2634_v19  ;;  %599 = vmatpush.bf16.msrb.mxu2 %v2178_v62  ;;  %v2218_v13 = vor.u32 %v2545_v10, %v2215_v11  ;;  %v2559_v10 = vld [vmem:[#allocation10 + $0x24] sm:$0xf]  ;;  %v2275_v11 = vld [vmem:[#allocation10 + $0x28] sm:$0xf0] }
  0xc8   :  { %v297_v25 = vpack.c.bf16 %v283_v20, %v283_v20  ;;  %v298_v26 = vpack.c.bf16 %v284_v21, %v284_v21  ;;  %v299_v27 = vpack.c.bf16 %v285_v22, %v285_v22  ;;  %304 = vst [vmem:[#allocation3 + $0x4] sm:$0x1] %v296_v23  ;;  %v622_v20 = vld [vmem:[#allocation2 + $0x1] sm:$0x1] }
  0xc9   :  { %v414_v28 = vmul.f32 0.5, %v413_v24  ;;  %v623_v22 = vunpack.c.l.bf16 %v622_v20 }
  0xca   :  { %305 = vst [vmem:[#allocation3 + $0x5] sm:$0x1] %v297_v25 }
  0xcb   :  { %306 = vst [vmem:[#allocation3 + $0x6] sm:$0x1] %v298_v26  ;;  %v415_v29 = vsel %vm2949_vm3, %v2634_v19, %v414_v28  ;;  %600 = vmatpush.bf16.msrb.mxu2 %v2170_v2 }
  0xcc   :  { %307 = vst [vmem:[#allocation3 + $0x7] sm:$0x1] %v299_v27  ;;  %418 = vrot.lane.b32.xlu0 %v415_v29, %s2850_s17  ;;  %v416_v42 = vmul.f32 0.0, %v415_v29 }
  0xcf   :  { %601 = vmatpush.bf16.msrb.mxu2 %v2162_v9  ;;  %v2546_v9 = vld [vmem:[#allocation10 + $0x14] sm:$0xf0] }
  0xd2   :  { %v626_v21 = vld [vmem:[#allocation3 + $0x6] sm:$0x1] }
  0xd3   :  { %v408_v30 = vld [vmem:[#allocation3 + $0x7] sm:$0x1]  ;;  %602 = vmatpush.bf16.msrb.mxu2 %v2154_v15  ;;  %v627_v23 = vunpack.c.l.bf16 %v626_v21  ;;  %v2544_v15 = vld [vmem:[#allocation10 + $0x4] sm:$0xf0] }
  0xd4   :  { %v409_v31 = vunpack.c.l.bf16 %v408_v30 }
  0xd6   :  { %v410_v32 = vadd.f32 %v409_v31, %v400_v61  ;;  %v2171_v61 = vld [vmem:[#allocation10 + $0x28] sm:$0xf0] }
  0xd7   :  { %v2174_v1 = vor.u32 %v2535_v60, %v2171_v61  ;;  %v2550_v60 = vld [vmem:[#allocation10 + $0x34] sm:$0xf0]  ;;  %v2549_v61 = vld [vmem:[#allocation10 + $0x34] sm:$0xf] }
  0xd8   :  { %v433_v33 = vmul.f32 %v410_v32, %v2958_v4  ;;  %v2230_v62 = vor.u32 %v2550_v60, %v2229_v59  ;;  %v2234_v2 = vor.u32 %v2549_v61, %v2231_v63 }
  0xd9   :  { %613 = vmatpush.bf16.msrb.mxu3 %v2174_v1  ;;  %v2548_v1 = vld [vmem:[#allocation10 + $0x24] sm:$0xf0] }
  0xda   :  { %2635 = vtanh.f32 %v433_v33  ;;  %818 = vmatpush.bf16.msra.mxu2 %v2230_v62  ;;  %v2222_v6 = vor.u32 %v2548_v1, %v2221_v0 }
  0xdd   :  { %614 = vmatpush.bf16.msrb.mxu3 %v2166_v8  ;;  %v2213_v8 = vld [vmem:[#allocation10 + $0x10] sm:$0xf] }
  0xde   :  { %819 = vmatpush.bf16.msra.mxu2 %v2222_v6  ;;  %v2283_v6 = vld [vmem:[#allocation10 + $0x38] sm:$0xf0] }
  0xe0   :  { %v2636_v34 = vpop.eup %2635 }
  0xe1   :  { %v435_v35 = vadd.f32 1.0, %v2636_v34  ;;  %615 = vmatpush.bf16.msrb.mxu3 %v2158_v12  ;;  %v2214_v12 = vor.u32 %v2546_v9, %v2213_v8  ;;  %v2560_v8 = vld [vmem:[#allocation10 + $0x24] sm:$0xf0]  ;;  %v2286_v9 = vor.u32 %v2561_v3, %v2283_v6 }
  0xe3   :  { %v436_v36 = vmul.f32 0.5, %v435_v35  ;;  %820 = vmatpush.bf16.msra.mxu2 %v2214_v12 }
  0xe5   :  { %v437_v37 = vsel %vm2949_vm3, %v2636_v34, %v436_v36  ;;  %831 = vmatpush.bf16.msra.mxu3 %v2234_v2  ;;  %v2562_v2 = vld [vmem:[#allocation10 + $0x34] sm:$0xf0] }
  0xe6   :  { %440 = vrot.lane.b32.xlu0 %v437_v37, %s2850_s17  ;;  %v438_v46 = vmul.f32 0.0, %v437_v37 }
  0xe9   :  { %832 = vmatpush.bf16.msra.mxu3 %v2226_v7  ;;  %v2273_v7 = vld [vmem:[#allocation10 + $0x20] sm:$0xf] }
  0xea   :  { %v2274_v12 = vor.u32 %v2560_v8, %v2273_v7  ;;  %v2573_v8 = vld [vmem:[#allocation10 + $0x34] sm:$0xf] }
  0xed   :  { %833 = vmatpush.bf16.msra.mxu3 %v2218_v13  ;;  %v2278_v13 = vor.u32 %v2559_v10, %v2275_v11  ;;  %v2574_v11 = vld [vmem:[#allocation10 + $0x34] sm:$0xf0] }
 0x13e   :  { %v419_v38 = vpop.permute.xlu0 %418 }
 0x13f   :  { %v421_v39 = vmul.f32 %v419_v38, %v415_v29 }
 0x141   :  { %423 = vrot.lane.b32.xlu1 %v421_v39, %s2863_s4 }
 0x158   :  { %v441_v40 = vpop.permute.xlu0 %440 }
 0x159   :  { %v443_v41 = vmul.f32 %v441_v40, %v437_v37 }
 0x15b   :  { %445 = vrot.lane.b32.xlu1 %v443_v41, %s2863_s4 }
 0x1b3   :  { %v424_v43 = vpop.permute.xlu1 %423 }
 0x1b4   :  { %v2970_v44 = vadd.f32 %v424_v43, %v416_v42 }
 0x1b6   :  { %2637 = vtanh.f32 %v2970_v44 }
 0x1bc   :  { %v2638_v45 = vpop.eup %2637 }
 0x1bd   :  { %429 = vrot.lane.b32.xlu2 %v2638_v45, %s2850_s17 }
 0x1cd   :  { %v446_v47 = vpop.permute.xlu1 %445 }
 0x1ce   :  { %v2974_v48 = vadd.f32 %v446_v47, %v438_v46 }
 0x1d0   :  { %2639 = vtanh.f32 %v2974_v48 }
 0x1d6   :  { %v2640_v49 = vpop.eup %2639 }
 0x1d7   :  { %451 = vrot.lane.b32.xlu2 %v2640_v49, %s2850_s17 }
 0x217   :  { %v430_v50 = vpop.permute.xlu2 %429 }
 0x218   :  { %v2978_v51 = vmul.f32 %v430_v50, %v415_v29 }
 0x21a   :  { %535 = vrot.lane.b32.xlu0 %v2978_v51, %s2863_s4 }
 0x231   :  { %v452_v52 = vpop.permute.xlu2 %451 }
 0x232   :  { %v2982_v53 = vmul.f32 %v452_v52, %v437_v37 }
 0x234   :  { %539 = vrot.lane.b32.xlu1 %v2982_v53, %s2850_s17 }
 0x28c   :  { %v536_v16 = vpop.permute.xlu0 %535 }
 0x2a6   :  { %v540_v17 = vpop.permute.xlu1 %539 }
 0x2a7   :  { %v542_v18 = vsel %vm179_vm0, %v536_v16, %v540_v17  ;;  %v2206_v16 = vor.u32 %v2544_v15, %v2205_v14  ;;  %v2543_v17 = vld [vmem:[#allocation10 + $0x4] sm:$0xf]  ;;  %v2265_v14 = vld [vmem:[#allocation10 + $0x10] sm:$0xf]  ;;  %v2558_v15 = vld [vmem:[#allocation10 + $0x14] sm:$0xf0] }
 0x2a8   :  { %v543_v19 = vpack.c.bf16 %v542_v18, %v542_v18  ;;  %v2207_v18 = vld [vmem:[#allocation10 + $0x8] sm:$0xf0] }
 0x2a9   :  { %821 = vmatpush.bf16.msra.mxu2 %v2206_v16  ;;  %v2557_v16 = vld [vmem:[#allocation10 + $0x14] sm:$0xf] }
 0x2aa   :  { %2183 = vmatmul.msk.bf16.vlgmr.msrb.gmra.mxu2 %vm374_vm4, %v543_v19  ;;  %2184 = vmatmul.msk.bf16.vlgmr.msrb.gmra.mxu3 %vm374_vm4, %v543_v19  ;;  %v2210_v19 = vor.u32 %v2543_v17, %v2207_v18  ;;  %v2267_v17 = vld [vmem:[#allocation10 + $0x18] sm:$0xf0]  ;;  %v2266_v18 = vor.u32 %v2558_v15, %v2265_v14  ;;  %v2325_v15 = vld [vmem:[#allocation10 + $0x20] sm:$0xf] }
 0x2ac   :  { %834 = vmatpush.bf16.msra.mxu3 %v2210_v19  ;;  %v2270_v19 = vor.u32 %v2557_v16, %v2267_v17  ;;  %v2572_v16 = vld [vmem:[#allocation10 + $0x24] sm:$0xf0] }
 0x2ad   :  { %v2326_v17 = vor.u32 %v2572_v16, %v2325_v15 }
 0x2b0   :  { %1050 = vmatpush.bf16.msrb.mxu3 %v2286_v9  ;;  %v2333_v9 = vld [vmem:[#allocation10 + $0x30] sm:$0xf] }
 0x2b1   :  { %v2334_v14 = vor.u32 %v2574_v11, %v2333_v9 }
 0x2b4   :  { %1051 = vmatpush.bf16.msrb.mxu3 %v2278_v13  ;;  %v2327_v13 = vld [vmem:[#allocation10 + $0x28] sm:$0xf0] }
 0x2b8   :  { %1052 = vmatpush.bf16.msrb.mxu3 %v2270_v19  ;;  %v2319_v19 = vld [vmem:[#allocation10 + $0x18] sm:$0xf0] }
 0x32d   :  { %v604_v24 = vpop.f32.mrf.mxu2  ;;  %v617_v25 = vpop.f32.mrf.mxu3 }
 0x32e   :  { %v624_v26 = vadd.f32 %v623_v22, %v604_v24  ;;  %v628_v27 = vadd.f32 %v627_v23, %v617_v25  ;;  %v841_v24 = vld [vmem:[#allocation2 + $0x2] sm:$0x1]  ;;  %v845_v25 = vld [vmem:[#allocation3 + $0x5] sm:$0x1] }
 0x330   :  { %v629_v28 = vmul.f32 %v624_v26, %v2958_v4  ;;  %v651_v29 = vmul.f32 %v628_v27, %v2958_v4  ;;  %v842_v26 = vunpack.c.l.bf16 %v841_v24  ;;  %v846_v27 = vunpack.c.l.bf16 %v845_v25 }
 0x332   :  { %2641 = vtanh.f32 %v629_v28 }
 0x333   :  { %2643 = vtanh.f32 %v651_v29 }
 0x335   :  { %v606_v30 = vpop.f32.mrf.mxu2  ;;  %v619_v31 = vpop.f32.mrf.mxu3 }
 0x338   :  { %v2642_v32 = vpop.eup %2641 }
 0x339   :  { %v2644_v33 = vpop.eup %2643  ;;  %v631_v34 = vadd.f32 1.0, %v2642_v32 }
 0x33a   :  { %v653_v35 = vadd.f32 1.0, %v2644_v33 }
 0x33b   :  { %v632_v36 = vmul.f32 0.5, %v631_v34 }
 0x33c   :  { %v654_v37 = vmul.f32 0.5, %v653_v35 }
 0x33d   :  { %v633_v38 = vsel %vm2949_vm3, %v2642_v32, %v632_v36 }
 0x33e   :  { %v655_v39 = vsel %vm2949_vm3, %v2644_v33, %v654_v37  ;;  %636 = vrot.lane.b32.xlu2 %v633_v38, %s2850_s17  ;;  %v634_v45 = vmul.f32 %v633_v38, %v2970_v44 }
 0x33f   :  { %658 = vrot.lane.b32.xlu0 %v655_v39, %s2850_s17  ;;  %v656_v47 = vmul.f32 %v655_v39, %v2974_v48 }
 0x398   :  { %v637_v40 = vpop.permute.xlu2 %636 }
 0x399   :  { %v639_v41 = vmul.f32 %v637_v40, %v633_v38 }
 0x39b   :  { %641 = vrot.lane.b32.xlu1 %v639_v41, %s2863_s4 }
 0x3b1   :  { %v659_v42 = vpop.permute.xlu0 %658 }
 0x3b2   :  { %v661_v43 = vmul.f32 %v659_v42, %v655_v39 }
 0x3b4   :  { %663 = vrot.lane.b32.xlu2 %v661_v43, %s2863_s4 }
 0x40d   :  { %v642_v46 = vpop.permute.xlu1 %641 }
 0x40e   :  { %v3001_v49 = vadd.f32 %v642_v46, %v634_v45  ;;  %v664_v50 = vpop.permute.xlu2 %663 }
 0x40f   :  { %v3003_v52 = vadd.f32 %v664_v50, %v656_v47 }
 0x410   :  { %2645 = vtanh.f32 %v3001_v49 }
 0x411   :  { %2647 = vtanh.f32 %v3003_v52 }
 0x416   :  { %v2646_v54 = vpop.eup %2645 }
 0x417   :  { %v2648_v55 = vpop.eup %2647  ;;  %647 = vrot.lane.b32.xlu0 %v2646_v54, %s2850_s17 }
 0x418   :  { %669 = vrot.lane.b32.xlu1 %v2648_v55, %s2850_s17 }
 0x489   :  { %v648_v56 = vpop.permute.xlu0 %647 }
 0x48a   :  { %v670_v44 = vpop.permute.xlu1 %669  ;;  %v3009_v57 = vmul.f32 %v648_v56, %v633_v38 }
 0x48b   :  { %v3011_v48 = vmul.f32 %v670_v44, %v655_v39 }
 0x48c   :  { %754 = vrot.lane.b32.xlu2 %v3009_v57, %s2863_s4 }
 0x48d   :  { %758 = vrot.lane.b32.xlu0 %v3011_v48, %s2850_s17 }
 0x4e6   :  { %v755_v20 = vpop.permute.xlu2 %754 }
 0x4ff   :  { %v759_v21 = vpop.permute.xlu0 %758 }
 0x500   :  { %v761_v22 = vsel %vm179_vm0, %v755_v20, %v759_v21  ;;  %v2257_v20 = vld [vmem:[#allocation10] sm:$0xf]  ;;  %v2556_v21 = vld [vmem:[#allocation10 + $0x4] sm:$0xf0] }
 0x501   :  { %v762_v23 = vpack.c.bf16 %v761_v22, %v761_v22  ;;  %v2555_v22 = vld [vmem:[#allocation10 + $0x4] sm:$0xf]  ;;  %v2258_v24 = vor.u32 %v2556_v21, %v2257_v20  ;;  %v2317_v20 = vld [vmem:[#allocation10 + $0x10] sm:$0xf]  ;;  %v2570_v21 = vld [vmem:[#allocation10 + $0x14] sm:$0xf0] }
 0x503   :  { %2235 = vmatmul.msk.bf16.vlgmr.msra.gmra.mxu2 %vm374_vm4, %v762_v23  ;;  %2236 = vmatmul.msk.bf16.vlgmr.msra.gmra.mxu3 %vm374_vm4, %v762_v23  ;;  %v2259_v23 = vld [vmem:[#allocation10 + $0x8] sm:$0xf0] }
 0x504   :  { %v2262_v25 = vor.u32 %v2555_v22, %v2259_v23  ;;  %v2318_v23 = vor.u32 %v2570_v21, %v2317_v20  ;;  %v2585_v20 = vld [vmem:[#allocation10 + $0x34] sm:$0xf] }
 0x506   :  { %1053 = vmatpush.bf16.msrb.mxu3 %v2262_v25  ;;  %v2311_v25 = vld [vmem:[#allocation10 + $0x8] sm:$0xf0] }
 0x586   :  { %v823_v28 = vpop.f32.mrf.mxu2  ;;  %v836_v29 = vpop.f32.mrf.mxu3 }
 0x587   :  { %v843_v30 = vadd.f32 %v842_v26, %v823_v28  ;;  %v847_v31 = vadd.f32 %v846_v27, %v836_v29 }
 0x589   :  { %v848_v32 = vmul.f32 %v843_v30, %v2958_v4  ;;  %v870_v33 = vmul.f32 %v847_v31, %v2958_v4  ;;  %v1060_v30 = vld [vmem:[#allocation2 + $0x3] sm:$0x1]  ;;  %v1064_v31 = vld [vmem:[#allocation3 + $0x4] sm:$0x1] }
 0x58b   :  { %2649 = vtanh.f32 %v848_v32  ;;  %v1061_v32 = vunpack.c.l.bf16 %v1060_v30 }
 0x58c   :  { %2651 = vtanh.f32 %v870_v33  ;;  %v1065_v33 = vunpack.c.l.bf16 %v1064_v31  ;;  %v2309_v31 = vld [vmem:[#allocation10] sm:$0xf] }
 0x58e   :  { %v825_v34 = vpop.f32.mrf.mxu2  ;;  %v838_v35 = vpop.f32.mrf.mxu3 }
 0x591   :  { %v2650_v36 = vpop.eup %2649 }
 0x592   :  { %v2652_v37 = vpop.eup %2651  ;;  %v850_v38 = vadd.f32 1.0, %v2650_v36 }
 0x593   :  { %v872_v39 = vadd.f32 1.0, %v2652_v37 }
 0x594   :  { %v851_v40 = vmul.f32 0.5, %v850_v38 }
 0x595   :  { %v873_v41 = vmul.f32 0.5, %v872_v39 }
 0x596   :  { %v852_v42 = vsel %vm2949_vm3, %v2650_v36, %v851_v40 }
 0x597   :  { %v874_v43 = vsel %vm2949_vm3, %v2652_v37, %v873_v41  ;;  %855 = vrot.lane.b32.xlu1 %v852_v42, %s2850_s17  ;;  %v853_v59 = vmul.f32 %v852_v42, %v3001_v49  ;;  %v2281_v49 = vld [vmem:[#allocation10 + $0x30] sm:$0xf] }
 0x598   :  { %877 = vrot.lane.b32.xlu2 %v874_v43, %s2850_s17  ;;  %v875_v54 = vmul.f32 %v874_v43, %v3003_v52  ;;  %v2282_v5 = vor.u32 %v2562_v2, %v2281_v49 }
 0x59a   :  { %1037 = vmatpush.bf16.msrb.mxu2 %v2282_v5 }
 0x59e   :  { %1038 = vmatpush.bf16.msrb.mxu2 %v2274_v12  ;;  %v2571_v12 = vld [vmem:[#allocation10 + $0x24] sm:$0xf] }
 0x5a2   :  { %1039 = vmatpush.bf16.msrb.mxu2 %v2266_v18  ;;  %v2569_v18 = vld [vmem:[#allocation10 + $0x14] sm:$0xf] }
 0x5a3   :  { %v2322_v22 = vor.u32 %v2569_v18, %v2319_v19  ;;  %v2385_v18 = vld [vmem:[#allocation10 + $0x30] sm:$0xf]  ;;  %v2586_v19 = vld [vmem:[#allocation10 + $0x34] sm:$0xf0] }
 0x5a4   :  { %v2386_v21 = vor.u32 %v2586_v19, %v2385_v18 }
 0x5a6   :  { %1040 = vmatpush.bf16.msrb.mxu2 %v2258_v24  ;;  %v2567_v24 = vld [vmem:[#allocation10 + $0x4] sm:$0xf] }
 0x5aa   :  { %1256 = vmatpush.bf16.msra.mxu2 %v2334_v14 }
 0x5ae   :  { %1257 = vmatpush.bf16.msra.mxu2 %v2326_v17 }
 0x5b2   :  { %1258 = vmatpush.bf16.msra.mxu2 %v2318_v23  ;;  %v2377_v23 = vld [vmem:[#allocation10 + $0x20] sm:$0xf] }
 0x5f2   :  { %v878_v45 = vpop.permute.xlu2 %877 }
 0x5f3   :  { %v880_v46 = vmul.f32 %v878_v45, %v874_v43 }
 0x5f5   :  { %882 = vrot.lane.b32.xlu1 %v880_v46, %s2863_s4 }
 0x609   :  { %v856_v47 = vpop.permute.xlu1 %855 }
 0x60a   :  { %v858_v50 = vmul.f32 %v856_v47, %v852_v42 }
 0x60c   :  { %860 = vrot.lane.b32.xlu0 %v858_v50, %s2863_s4 }
 0x667   :  { %v883_v55 = vpop.permute.xlu1 %882 }
 0x668   :  { %v3031_v56 = vadd.f32 %v883_v55, %v875_v54 }
 0x66a   :  { %2653 = vtanh.f32 %v3031_v56 }
 0x670   :  { %v2654_v44 = vpop.eup %2653 }
 0x671   :  { %888 = vrot.lane.b32.xlu0 %v2654_v44, %s2850_s17 }
 0x67e   :  { %v861_v60 = vpop.permute.xlu0 %860 }
 0x67f   :  { %v3036_v61 = vadd.f32 %v861_v60, %v853_v59 }
 0x681   :  { %2655 = vtanh.f32 %v3036_v61 }
 0x687   :  { %v2656_v62 = vpop.eup %2655 }
 0x688   :  { %866 = vrot.lane.b32.xlu2 %v2656_v62, %s2850_s17 }
 0x6e2   :  { %v867_v63 = vpop.permute.xlu2 %866 }
 0x6e3   :  { %v889_v52 = vpop.permute.xlu0 %888  ;;  %v3040_v0 = vmul.f32 %v867_v63, %v852_v42 }
 0x6e4   :  { %v3042_v1 = vmul.f32 %v889_v52, %v874_v43 }
 0x6e5   :  { %973 = vrot.lane.b32.xlu1 %v3040_v0, %s2863_s4 }
 0x6e6   :  { %977 = vrot.lane.b32.xlu2 %v3042_v1, %s2850_s17 }
 0x740   :  { %v978_v26 = vpop.permute.xlu2 %977 }
 0x757   :  { %v974_v27 = vpop.permute.xlu1 %973 }
 0x758   :  { %v980_v28 = vsel %vm179_vm0, %v974_v27, %v978_v26  ;;  %v2314_v26 = vor.u32 %v2567_v24, %v2311_v25  ;;  %v2584_v24 = vld [vmem:[#allocation10 + $0x24] sm:$0xf0] }
 0x759   :  { %v981_v29 = vpack.c.bf16 %v980_v28, %v980_v28 }
 0x75b   :  { %2287 = vmatmul.msk.bf16.vlgmr.msrb.gmra.mxu2 %vm374_vm4, %v981_v29  ;;  %2288 = vmatmul.msk.bf16.vlgmr.msrb.gmra.mxu3 %vm374_vm4, %v981_v29 }
 0x7de   :  { %v1042_v34 = vpop.f32.mrf.mxu2  ;;  %v1055_v35 = vpop.f32.mrf.mxu3 }
 0x7df   :  { %v1062_v36 = vadd.f32 %v1061_v32, %v1042_v34  ;;  %v1066_v37 = vadd.f32 %v1065_v33, %v1055_v35  ;;  %v2568_v32 = vld [vmem:[#allocation10 + $0x4] sm:$0xf0] }
 0x7e0   :  { %v2310_v33 = vor.u32 %v2568_v32, %v2309_v31  ;;  %v2369_v32 = vld [vmem:[#allocation10 + $0x10] sm:$0xf] }
 0x7e1   :  { %v1067_v38 = vmul.f32 %v1062_v36, %v2958_v4  ;;  %v1089_v39 = vmul.f32 %v1066_v37, %v2958_v4 }
 0x7e2   :  { %1259 = vmatpush.bf16.msra.mxu2 %v2310_v33  ;;  %v2582_v33 = vld [vmem:[#allocation10 + $0x14] sm:$0xf0] }
 0x7e3   :  { %2657 = vtanh.f32 %v1067_v38  ;;  %v1279_v38 = vld [vmem:[#allocation2 + $0x4] sm:$0x1] }
 0x7e4   :  { %2659 = vtanh.f32 %v1089_v39  ;;  %v1283_v39 = vld [vmem:[#allocation3 + $0x3] sm:$0x1] }
 0x7e6   :  { %v1044_v40 = vpop.f32.mrf.mxu2  ;;  %v1057_v41 = vpop.f32.mrf.mxu3  ;;  %1473 = vmatpush.bf16.msrb.mxu2 %v2386_v21 }
 0x7e7   :  { %v1280_v40 = vunpack.c.l.bf16 %v1279_v38  ;;  %v1284_v41 = vunpack.c.l.bf16 %v1283_v39  ;;  %v2361_v38 = vld [vmem:[#allocation10] sm:$0xf]  ;;  %v2580_v39 = vld [vmem:[#allocation10 + $0x4] sm:$0xf0] }
 0x7e9   :  { %v2658_v42 = vpop.eup %2657 }
 0x7ea   :  { %v2660_v43 = vpop.eup %2659  ;;  %v1069_v45 = vadd.f32 1.0, %v2658_v42 }
 0x7eb   :  { %v1091_v46 = vadd.f32 1.0, %v2660_v43 }
 0x7ec   :  { %v1070_v47 = vmul.f32 0.5, %v1069_v45 }
 0x7ed   :  { %v1092_v50 = vmul.f32 0.5, %v1091_v46 }
 0x7ee   :  { %v1071_v54 = vsel %vm2949_vm3, %v2658_v42, %v1070_v47 }
 0x7ef   :  { %v1093_v55 = vsel %vm2949_vm3, %v2660_v43, %v1092_v50  ;;  %1074 = vrot.lane.b32.xlu0 %v1071_v54, %s2850_s17  ;;  %v1072_v63 = vmul.f32 %v1071_v54, %v3036_v61  ;;  %v2335_v61 = vld [vmem:[#allocation10 + $0x38] sm:$0xf0] }
 0x7f0   :  { %1096 = vrot.lane.b32.xlu1 %v1093_v55, %s2850_s17  ;;  %v1094_v3 = vmul.f32 %v1093_v55, %v3031_v56  ;;  %v2338_v10 = vor.u32 %v2573_v8, %v2335_v61  ;;  %v2330_v56 = vor.u32 %v2571_v12, %v2327_v13 }
 0x7f2   :  { %1269 = vmatpush.bf16.msra.mxu3 %v2338_v10 }
 0x7f6   :  { %1270 = vmatpush.bf16.msra.mxu3 %v2330_v56 }
 0x7fa   :  { %1271 = vmatpush.bf16.msra.mxu3 %v2322_v22  ;;  %v2387_v22 = vld [vmem:[#allocation10 + $0x38] sm:$0xf0] }
 0x7fb   :  { %v2390_v25 = vor.u32 %v2585_v20, %v2387_v22 }
 0x7fe   :  { %1272 = vmatpush.bf16.msra.mxu3 %v2314_v26  ;;  %v2583_v26 = vld [vmem:[#allocation10 + $0x24] sm:$0xf] }
 0x802   :  { %1486 = vmatpush.bf16.msrb.mxu3 %v2390_v25 }
 0x861   :  { %v1075_v44 = vpop.permute.xlu0 %1074 }
 0x862   :  { %v1097_v59 = vpop.permute.xlu1 %1096  ;;  %v1077_v60 = vmul.f32 %v1075_v44, %v1071_v54 }
 0x863   :  { %v1099_v62 = vmul.f32 %v1097_v59, %v1093_v55 }
 0x864   :  { %1079 = vrot.lane.b32.xlu2 %v1077_v60, %s2863_s4 }
 0x865   :  { %1101 = vrot.lane.b32.xlu0 %v1099_v62, %s2863_s4 }
 0x8be   :  { %v1080_v52 = vpop.permute.xlu2 %1079 }
 0x8bf   :  { %v3062_v49 = vadd.f32 %v1080_v52, %v1072_v63 }
 0x8c1   :  { %2661 = vtanh.f32 %v3062_v49 }
 0x8c7   :  { %v2662_v2 = vpop.eup %2661 }
 0x8c8   :  { %1085 = vrot.lane.b32.xlu1 %v2662_v2, %s2850_s17 }
 0x8d7   :  { %v1102_v5 = vpop.permute.xlu0 %1101 }
 0x8d8   :  { %v3067_v6 = vadd.f32 %v1102_v5, %v1094_v3 }
 0x8da   :  { %2663 = vtanh.f32 %v3067_v6 }
 0x8e0   :  { %v2664_v7 = vpop.eup %2663 }
 0x8e1   :  { %1107 = vrot.lane.b32.xlu2 %v2664_v7, %s2850_s17 }
 0x93a   :  { %v1086_v27 = vpop.permute.xlu1 %1085 }
 0x93b   :  { %v1108_v28 = vpop.permute.xlu2 %1107  ;;  %v3071_v29 = vmul.f32 %v1086_v27, %v1071_v54  ;;  %v2379_v27 = vld [vmem:[#allocation10 + $0x28] sm:$0xf0] }
 0x93c   :  { %v3073_v30 = vmul.f32 %v1108_v28, %v1093_v55  ;;  %v2378_v28 = vor.u32 %v2584_v24, %v2377_v23  ;;  %v2382_v31 = vor.u32 %v2583_v26, %v2379_v27 }
 0x93d   :  { %1192 = vrot.lane.b32.xlu0 %v3071_v29, %s2863_s4 }
 0x93e   :  { %1196 = vrot.lane.b32.xlu1 %v3073_v30, %s2850_s17  ;;  %1474 = vmatpush.bf16.msrb.mxu2 %v2378_v28 }
 0x93f   :  { %1487 = vmatpush.bf16.msrb.mxu3 %v2382_v31 }
 0x9af   :  { %v1193_v34 = vpop.permute.xlu0 %1192 }
 0x9b0   :  { %v1197_v35 = vpop.permute.xlu1 %1196 }
 0x9b1   :  { %v1199_v36 = vsel %vm179_vm0, %v1193_v34, %v1197_v35  ;;  %v2581_v34 = vld [vmem:[#allocation10 + $0x14] sm:$0xf]  ;;  %v2371_v35 = vld [vmem:[#allocation10 + $0x18] sm:$0xf0] }
 0x9b2   :  { %v1200_v37 = vpack.c.bf16 %v1199_v36, %v1199_v36  ;;  %v2370_v36 = vor.u32 %v2582_v33, %v2369_v32  ;;  %v2598_v33 = vld [vmem:[#allocation10 + $0x34] sm:$0xf0] }
 0x9b4   :  { %2339 = vmatmul.msk.bf16.vlgmr.msra.gmra.mxu2 %vm374_vm4, %v1200_v37  ;;  %2340 = vmatmul.msk.bf16.vlgmr.msra.gmra.mxu3 %vm374_vm4, %v1200_v37  ;;  %v2374_v37 = vor.u32 %v2581_v34, %v2371_v35  ;;  %v2597_v34 = vld [vmem:[#allocation10 + $0x34] sm:$0xf] }
 0x9b5   :  { %1475 = vmatpush.bf16.msrb.mxu2 %v2370_v36  ;;  %v2439_v36 = vld [vmem:[#allocation10 + $0x38] sm:$0xf0] }
 0x9b6   :  { %1488 = vmatpush.bf16.msrb.mxu3 %v2374_v37  ;;  %v2429_v37 = vld [vmem:[#allocation10 + $0x20] sm:$0xf] }
 0xa37   :  { %v1261_v42 = vpop.f32.mrf.mxu2  ;;  %v1274_v43 = vpop.f32.mrf.mxu3 }
 0xa38   :  { %v1281_v45 = vadd.f32 %v1280_v40, %v1261_v42  ;;  %v1285_v46 = vadd.f32 %v1284_v41, %v1274_v43  ;;  %v2362_v40 = vor.u32 %v2580_v39, %v2361_v38  ;;  %v2579_v41 = vld [vmem:[#allocation10 + $0x4] sm:$0xf]  ;;  %v2363_v42 = vld [vmem:[#allocation10 + $0x8] sm:$0xf0]  ;;  %v2596_v38 = vld [vmem:[#allocation10 + $0x24] sm:$0xf0]  ;;  %v2442_v39 = vor.u32 %v2597_v34, %v2439_v36 }
 0xa39   :  { %v2366_v43 = vor.u32 %v2579_v41, %v2363_v42  ;;  %v2431_v41 = vld [vmem:[#allocation10 + $0x28] sm:$0xf0]  ;;  %v2430_v42 = vor.u32 %v2596_v38, %v2429_v37 }
 0xa3a   :  { %v1286_v47 = vmul.f32 %v1281_v45, %v2958_v4  ;;  %v1308_v50 = vmul.f32 %v1285_v46, %v2958_v4  ;;  %1476 = vmatpush.bf16.msrb.mxu2 %v2362_v40  ;;  %v2595_v40 = vld [vmem:[#allocation10 + $0x24] sm:$0xf] }
 0xa3b   :  { %1489 = vmatpush.bf16.msrb.mxu3 %v2366_v43  ;;  %v2434_v43 = vor.u32 %v2595_v40, %v2431_v41 }
 0xa3c   :  { %2665 = vtanh.f32 %v1286_v47 }
 0xa3d   :  { %2667 = vtanh.f32 %v1308_v50 }
 0xa3f   :  { %v1263_v54 = vpop.f32.mrf.mxu2  ;;  %v1276_v55 = vpop.f32.mrf.mxu3  ;;  %1703 = vmatpush.bf16.msra.mxu3 %v2442_v39 }
 0xa40   :  { %v1496_v54 = vld [vmem:[#allocation2 + $0x5] sm:$0x1]  ;;  %v1500_v55 = vld [vmem:[#allocation3 + $0x2] sm:$0x1] }
 0xa42   :  { %v2666_v44 = vpop.eup %2665 }
 0xa43   :  { %v2668_v59 = vpop.eup %2667  ;;  %v1288_v60 = vadd.f32 1.0, %v2666_v44  ;;  %1704 = vmatpush.bf16.msra.mxu3 %v2434_v43 }
 0xa44   :  { %v1310_v62 = vadd.f32 1.0, %v2668_v59 }
 0xa45   :  { %v1289_v63 = vmul.f32 0.5, %v1288_v60 }
 0xa46   :  { %v1311_v52 = vmul.f32 0.5, %v1310_v62 }
 0xa47   :  { %v1290_v2 = vsel %vm2949_vm3, %v2666_v44, %v1289_v63  ;;  %v1497_v44 = vunpack.c.l.bf16 %v1496_v54 }
 0xa48   :  { %v1312_v3 = vsel %vm2949_vm3, %v2668_v59, %v1311_v52  ;;  %1293 = vrot.lane.b32.xlu2 %v1290_v2, %s2850_s17  ;;  %v1291_v9 = vmul.f32 %v1290_v2, %v3062_v49  ;;  %v1501_v59 = vunpack.c.l.bf16 %v1500_v55 }
 0xa49   :  { %1315 = vrot.lane.b32.xlu0 %v1312_v3, %s2850_s17  ;;  %v1313_v11 = vmul.f32 %v1312_v3, %v3067_v6 }
 0xaa2   :  { %v1294_v5 = vpop.permute.xlu2 %1293 }
 0xaa3   :  { %v1296_v7 = vmul.f32 %v1294_v5, %v1290_v2 }
 0xaa5   :  { %1298 = vrot.lane.b32.xlu1 %v1296_v7, %s2863_s4 }
 0xabb   :  { %v1316_v8 = vpop.permute.xlu0 %1315 }
 0xabc   :  { %v1318_v61 = vmul.f32 %v1316_v8, %v1312_v3 }
 0xabe   :  { %1320 = vrot.lane.b32.xlu2 %v1318_v61, %s2863_s4 }
 0xb17   :  { %v1299_v10 = vpop.permute.xlu1 %1298 }
 0xb18   :  { %v3094_v12 = vadd.f32 %v1299_v10, %v1291_v9  ;;  %v1321_v13 = vpop.permute.xlu2 %1320 }
 0xb19   :  { %v3096_v14 = vadd.f32 %v1321_v13, %v1313_v11 }
 0xb1a   :  { %2669 = vtanh.f32 %v3094_v12 }
 0xb1b   :  { %2671 = vtanh.f32 %v3096_v14 }
 0xb20   :  { %v2670_v15 = vpop.eup %2669 }
 0xb21   :  { %v2672_v16 = vpop.eup %2671  ;;  %1304 = vrot.lane.b32.xlu0 %v2670_v15, %s2850_s17 }
 0xb22   :  { %1326 = vrot.lane.b32.xlu1 %v2672_v16, %s2850_s17 }
 0xb93   :  { %v1305_v56 = vpop.permute.xlu0 %1304 }
 0xb94   :  { %v1327_v49 = vpop.permute.xlu1 %1326  ;;  %v3102_v17 = vmul.f32 %v1305_v56, %v1290_v2 }
 0xb95   :  { %v3104_v6 = vmul.f32 %v1327_v49, %v1312_v3 }
 0xb96   :  { %1409 = vrot.lane.b32.xlu2 %v3102_v17, %s2863_s4 }
 0xb97   :  { %1413 = vrot.lane.b32.xlu0 %v3104_v6, %s2850_s17 }
 0xbf0   :  { %v1410_v45 = vpop.permute.xlu2 %1409 }
 0xc09   :  { %v1414_v46 = vpop.permute.xlu0 %1413 }
 0xc0a   :  { %v1416_v47 = vsel %vm179_vm0, %v1410_v45, %v1414_v46  ;;  %v2421_v45 = vld [vmem:[#allocation10 + $0x10] sm:$0xf]  ;;  %v2594_v46 = vld [vmem:[#allocation10 + $0x14] sm:$0xf0] }
 0xc0b   :  { %v1417_v50 = vpack.c.bf16 %v1416_v47, %v1416_v47  ;;  %v2593_v47 = vld [vmem:[#allocation10 + $0x14] sm:$0xf]  ;;  %v2422_v54 = vor.u32 %v2594_v46, %v2421_v45 }
 0xc0d   :  { %2391 = vmatmul.msk.bf16.vlgmr.msrb.gmra.mxu2 %vm374_vm4, %v1417_v50  ;;  %2392 = vmatmul.msk.bf16.vlgmr.msrb.gmra.mxu3 %vm374_vm4, %v1417_v50  ;;  %v2423_v50 = vld [vmem:[#allocation10 + $0x18] sm:$0xf0] }
 0xc0e   :  { %v2426_v55 = vor.u32 %v2593_v47, %v2423_v50  ;;  %v2610_v50 = vld [vmem:[#allocation10 + $0x34] sm:$0xf0] }
 0xc10   :  { %1705 = vmatpush.bf16.msra.mxu3 %v2426_v55 }
 0xc90   :  { %v1478_v60 = vpop.f32.mrf.mxu2  ;;  %v1491_v62 = vpop.f32.mrf.mxu3 }
 0xc91   :  { %v1498_v63 = vadd.f32 %v1497_v44, %v1478_v60  ;;  %v1502_v52 = vadd.f32 %v1501_v59, %v1491_v62  ;;  %v2413_v44 = vld [vmem:[#allocation10] sm:$0xf]  ;;  %v2592_v59 = vld [vmem:[#allocation10 + $0x4] sm:$0xf0]  ;;  %v2591_v60 = vld [vmem:[#allocation10 + $0x4] sm:$0xf] }
 0xc92   :  { %v2415_v62 = vld [vmem:[#allocation10 + $0x8] sm:$0xf0] }
 0xc93   :  { %v1503_v2 = vmul.f32 %v1498_v63, %v2958_v4  ;;  %v1525_v3 = vmul.f32 %v1502_v52, %v2958_v4  ;;  %v2414_v63 = vor.u32 %v2592_v59, %v2413_v44  ;;  %v2418_v52 = vor.u32 %v2591_v60, %v2415_v62  ;;  %v2491_v44 = vld [vmem:[#allocation10 + $0x38] sm:$0xf0]  ;;  %v2481_v59 = vld [vmem:[#allocation10 + $0x20] sm:$0xf]  ;;  %v2608_v60 = vld [vmem:[#allocation10 + $0x24] sm:$0xf0] }
 0xc95   :  { %2673 = vtanh.f32 %v1503_v2  ;;  %1706 = vmatpush.bf16.msra.mxu3 %v2418_v52  ;;  %v2483_v52 = vld [vmem:[#allocation10 + $0x28] sm:$0xf0] }
 0xc96   :  { %2675 = vtanh.f32 %v1525_v3 }
 0xc98   :  { %v1480_v5 = vpop.f32.mrf.mxu2  ;;  %v1493_v7 = vpop.f32.mrf.mxu3 }
 0xc9b   :  { %v2674_v8 = vpop.eup %2673 }
 0xc9c   :  { %v2676_v61 = vpop.eup %2675  ;;  %v1505_v9 = vadd.f32 1.0, %v2674_v8 }
 0xc9d   :  { %v1527_v10 = vadd.f32 1.0, %v2676_v61 }
 0xc9e   :  { %v1506_v11 = vmul.f32 0.5, %v1505_v9 }
 0xc9f   :  { %v1528_v13 = vmul.f32 0.5, %v1527_v10 }
 0xca0   :  { %v1507_v15 = vsel %vm2949_vm3, %v2674_v8, %v1506_v11  ;;  %v1713_v8 = vld [vmem:[#allocation2 + $0x6] sm:$0x1] }
 0xca1   :  { %v1529_v16 = vsel %vm2949_vm3, %v2676_v61, %v1528_v13  ;;  %1510 = vrot.lane.b32.xlu1 %v1507_v15, %s2850_s17  ;;  %v1508_v24 = vmul.f32 %v1507_v15, %v3094_v12  ;;  %v2437_v12 = vld [vmem:[#allocation10 + $0x30] sm:$0xf]  ;;  %v1717_v61 = vld [vmem:[#allocation3 + $0x1] sm:$0x1]  ;;  %v1714_v9 = vunpack.c.l.bf16 %v1713_v8  ;;  %v2605_v8 = vld [vmem:[#allocation10 + $0x14] sm:$0xf] }
 0xca2   :  { %1532 = vrot.lane.b32.xlu2 %v1529_v16, %s2850_s17  ;;  %v1530_v20 = vmul.f32 %v1529_v16, %v3096_v14  ;;  %v2438_v35 = vor.u32 %v2598_v33, %v2437_v12  ;;  %v1718_v10 = vunpack.c.l.bf16 %v1717_v61  ;;  %v2475_v61 = vld [vmem:[#allocation10 + $0x18] sm:$0xf0] }
 0xca4   :  { %1690 = vmatpush.bf16.msra.mxu2 %v2438_v35 }
 0xca8   :  { %1691 = vmatpush.bf16.msra.mxu2 %v2430_v42 }
 0xcac   :  { %1692 = vmatpush.bf16.msra.mxu2 %v2422_v54  ;;  %v2609_v54 = vld [vmem:[#allocation10 + $0x34] sm:$0xf] }
 0xcad   :  { %v2494_v62 = vor.u32 %v2609_v54, %v2491_v44 }
 0xcaf   :  { %1920 = vmatpush.bf16.msrb.mxu3 %v2494_v62 }
 0xcb0   :  { %1693 = vmatpush.bf16.msra.mxu2 %v2414_v63  ;;  %v2607_v63 = vld [vmem:[#allocation10 + $0x24] sm:$0xf] }
 0xcfc   :  { %v1533_v56 = vpop.permute.xlu2 %1532 }
 0xcfd   :  { %v1535_v49 = vmul.f32 %v1533_v56, %v1529_v16 }
 0xcff   :  { %1537 = vrot.lane.b32.xlu1 %v1535_v49, %s2863_s4 }
 0xd13   :  { %v1511_v18 = vpop.permute.xlu1 %1510 }
 0xd14   :  { %v1513_v19 = vmul.f32 %v1511_v18, %v1507_v15 }
 0xd16   :  { %1515 = vrot.lane.b32.xlu0 %v1513_v19, %s2863_s4 }
 0xd71   :  { %v1538_v21 = vpop.permute.xlu1 %1537 }
 0xd72   :  { %v3124_v22 = vadd.f32 %v1538_v21, %v1530_v20 }
 0xd74   :  { %2677 = vtanh.f32 %v3124_v22 }
 0xd7a   :  { %v2678_v23 = vpop.eup %2677 }
 0xd7b   :  { %1543 = vrot.lane.b32.xlu0 %v2678_v23, %s2850_s17 }
 0xd88   :  { %v1516_v25 = vpop.permute.xlu0 %1515 }
 0xd89   :  { %v3129_v26 = vadd.f32 %v1516_v25, %v1508_v24 }
 0xd8b   :  { %2679 = vtanh.f32 %v3129_v26 }
 0xd91   :  { %v2680_v27 = vpop.eup %2679 }
 0xd92   :  { %1521 = vrot.lane.b32.xlu2 %v2680_v27, %s2850_s17 }
 0xdec   :  { %v1522_v28 = vpop.permute.xlu2 %1521 }
 0xded   :  { %v1544_v14 = vpop.permute.xlu0 %1543  ;;  %v3133_v31 = vmul.f32 %v1522_v28, %v1507_v15 }
 0xdee   :  { %v3135_v32 = vmul.f32 %v1544_v14, %v1529_v16 }
 0xdef   :  { %1626 = vrot.lane.b32.xlu1 %v3133_v31, %s2863_s4 }
 0xdf0   :  { %1630 = vrot.lane.b32.xlu2 %v3135_v32, %s2850_s17 }
 0xe4a   :  { %v1631_v2 = vpop.permute.xlu2 %1630 }
 0xe61   :  { %v1627_v3 = vpop.permute.xlu1 %1626 }
 0xe62   :  { %v1633_v5 = vsel %vm179_vm0, %v1627_v3, %v1631_v2  ;;  %v2482_v2 = vor.u32 %v2608_v60, %v2481_v59  ;;  %v2486_v3 = vor.u32 %v2607_v63, %v2483_v52 }
 0xe63   :  { %v1634_v7 = vpack.c.bf16 %v1633_v5, %v1633_v5  ;;  %v2473_v5 = vld [vmem:[#allocation10 + $0x10] sm:$0xf] }
 0xe64   :  { %1921 = vmatpush.bf16.msrb.mxu3 %v2486_v3  ;;  %v2530_v3 = vld [vmem:[#allocation13 + $0x8] sm:$0xff] }
 0xe65   :  { %2443 = vmatmul.msk.bf16.vlgmr.msra.gmra.mxu2 %vm374_vm4, %v1634_v7  ;;  %2444 = vmatmul.msk.bf16.vlgmr.msra.gmra.mxu3 %vm374_vm4, %v1634_v7  ;;  %v2606_v7 = vld [vmem:[#allocation10 + $0x14] sm:$0xf0] }
 0xe66   :  { %525 = vmatpush.bf16.msrb.mxu1 %v2530_v3 }
 0xe6a   :  { %526 = vmatpush.bf16.msrb.mxu1 %v2529_v58 }
 0xee8   :  { %v1695_v11 = vpop.f32.mrf.mxu2  ;;  %v1708_v13 = vpop.f32.mrf.mxu3 }
 0xee9   :  { %v1715_v15 = vadd.f32 %v1714_v9, %v1695_v11  ;;  %v1719_v16 = vadd.f32 %v1718_v10, %v1708_v13  ;;  %v456_v9 = vpack.c.bf16 %v2978_v51, %v2978_v51  ;;  %v2474_v10 = vor.u32 %v2606_v7, %v2473_v5  ;;  %v2465_v13 = vld [vmem:[#allocation10] sm:$0xf]  ;;  %v2542_v5 = vld [vmem:[#allocation13 + $0x8] sm:$0xff]  ;;  %v2541_v7 = vld [vmem:[#allocation13] sm:$0xff] }
 0xeea   :  { %v2478_v11 = vor.u32 %v2605_v8, %v2475_v61  ;;  %v894_v51 = vpack.c.bf16 %v3040_v0, %v3040_v0  ;;  %744 = vmatpush.bf16.msra.mxu1 %v2542_v5  ;;  %v2540_v8 = vld [vmem:[#allocation12 + $0x8] sm:$0xff]  ;;  %v2539_v61 = vld [vmem:[#allocation12] sm:$0xff] }
 0xeeb   :  { %v1720_v56 = vmul.f32 %v1715_v15, %v2958_v4  ;;  %v1742_v49 = vmul.f32 %v1719_v16, %v2958_v4  ;;  %v2604_v15 = vld [vmem:[#allocation10 + $0x4] sm:$0xf0]  ;;  %v2603_v16 = vld [vmem:[#allocation10 + $0x4] sm:$0xf] }
 0xeec   :  { %1922 = vmatpush.bf16.msrb.mxu3 %v2478_v11  ;;  %v934_v11 = vpack.c.bf16 %v3042_v1, %v3042_v1 }
 0xeed   :  { %2681 = vtanh.f32 %v1720_v56  ;;  %v2467_v56 = vld [vmem:[#allocation10 + $0x8] sm:$0xf0] }
 0xeee   :  { %2683 = vtanh.f32 %v1742_v49  ;;  %v2466_v49 = vor.u32 %v2604_v15, %v2465_v13  ;;  %745 = vmatpush.bf16.msra.mxu1 %v2541_v7  ;;  %v2551_v13 = vld [vmem:[#allocation12] sm:$0xff]  ;;  %v1331_v15 = vpack.c.bf16 %v3102_v17, %v3102_v17  ;;  %v1370_v17 = vpack.c.bf16 %v3104_v6, %v3104_v6  ;;  %v2566_v6 = vld [vmem:[#allocation13 + $0x8] sm:$0xff] }
 0xef0   :  { %v1697_v18 = vpop.f32.mrf.mxu2  ;;  %v1710_v19 = vpop.f32.mrf.mxu3 }
 0xef1   :  { %v2470_v18 = vor.u32 %v2603_v16, %v2467_v56  ;;  %v715_v19 = vpack.c.bf16 %v3011_v48, %v3011_v48 }
 0xef3   :  { %v2682_v20 = vpop.eup %2681  ;;  %1923 = vmatpush.bf16.msrb.mxu3 %v2470_v18  ;;  %v1113_v18 = vpack.c.bf16 %v3071_v29, %v3071_v29 }
 0xef4   :  { %v2684_v21 = vpop.eup %2683  ;;  %v1722_v23 = vadd.f32 1.0, %v2682_v20 }
 0xef5   :  { %v1744_v24 = vadd.f32 1.0, %v2684_v21 }
 0xef6   :  { %v1723_v25 = vmul.f32 0.5, %v1722_v23  ;;  %v2527_v23 = vld [vmem:[#allocation12] sm:$0xff] }
 0xef7   :  { %v1745_v27 = vmul.f32 0.5, %v1744_v24 }
 0xef8   :  { %v1724_v28 = vsel %vm2949_vm3, %v2682_v20, %v1723_v25  ;;  %v1153_v20 = vpack.c.bf16 %v3073_v30, %v3073_v30  ;;  %v2632_v25 = vld [vmem:[%s3304_s8] ss:$0 sm:$0xff] }
 0xef9   :  { %v1746_v14 = vsel %vm2949_vm3, %v2684_v21, %v1745_v27  ;;  %1727 = vrot.lane.b32.xlu0 %v1724_v28, %s2850_s17  ;;  %v1725_v36 = vmul.f32 %v1724_v28, %v3129_v26  ;;  %v2528_v21 = vld [vmem:[#allocation12 + $0x8] sm:$0xff]  ;;  %312 = vst [vmem:[#allocation4] sm:$0x3] %v2632_v25 }
 0xefa   :  { %1749 = vrot.lane.b32.xlu1 %v1746_v14, %s2850_s17  ;;  %v1747_v40 = vmul.f32 %v1746_v14, %v3124_v22  ;;  %v2489_v22 = vld [vmem:[#allocation10 + $0x30] sm:$0xf]  ;;  %485 = vmatpush.bf16.msrb.mxu0 %v2528_v21  ;;  %313 = vst [vmem:[#allocation4 + $0x2] sm:$0x3] %v2632_v25 }
 0xefb   :  { %v2490_v55 = vor.u32 %v2610_v50, %v2489_v22  ;;  %314 = vst [vmem:[#allocation4 + $0x4] sm:$0x3] %v2632_v25  ;;  %v2553_v21 = vld [vmem:[#allocation13] sm:$0xff] }
 0xefc   :  { %315 = vst [vmem:[#allocation4 + $0x6] sm:$0x3] %v2632_v25 }
 0xefd   :  { %1907 = vmatpush.bf16.msrb.mxu2 %v2490_v55  ;;  %316 = vst [vmem:[#allocation4 + $0x8] sm:$0x3] %v2632_v25 }
 0xefe   :  { %486 = vmatpush.bf16.msrb.mxu0 %v2527_v23  ;;  %317 = vst [vmem:[#allocation4 + $0xa] sm:$0x3] %v2632_v25  ;;  %v2565_v23 = vld [vmem:[#allocation13] sm:$0xff] }
 0xeff   :  { %318 = vst [vmem:[#allocation4 + $0xc] sm:$0x3] %v2632_v25 }
 0xf00   :  { %319 = vst [vmem:[#allocation4 + $0xe] sm:$0x3] %v2632_v25 }
 0xf01   :  { %1908 = vmatpush.bf16.msrb.mxu2 %v2482_v2  ;;  %v675_v2 = vpack.c.bf16 %v3009_v57, %v3009_v57  ;;  %v2552_v57 = vld [vmem:[#allocation12 + $0x8] sm:$0xff] }
 0xf02   :  { %704 = vmatpush.bf16.msra.mxu0 %v2540_v8  ;;  %v893_v3 = vld [vmem:[#allocation4 + $0x4] sm:$0x3] }
 0xf05   :  { %1909 = vmatpush.bf16.msrb.mxu2 %v2474_v10 }
 0xf06   :  { %705 = vmatpush.bf16.msra.mxu0 %v2539_v61  ;;  %v2589_v61 = vld [vmem:[#allocation13] sm:$0xff] }
 0xf09   :  { %1910 = vmatpush.bf16.msrb.mxu2 %v2466_v49 }
 0xf6b   :  { %v1728_v12 = vpop.permute.xlu0 %1727 }
 0xf6c   :  { %v1750_v33 = vpop.permute.xlu1 %1749  ;;  %v1730_v34 = vmul.f32 %v1728_v12, %v1724_v28  ;;  %v455_v12 = vld [vmem:[#allocation4] sm:$0x3] }
 0xf6d   :  { %v1752_v35 = vmul.f32 %v1750_v33, %v1746_v14 }
 0xf6e   :  { %1732 = vrot.lane.b32.xlu2 %v1730_v34, %s2863_s4 }
 0xf6f   :  { %1754 = vrot.lane.b32.xlu0 %v1752_v35, %s2863_s4 }
 0xfc8   :  { %v1733_v37 = vpop.permute.xlu2 %1732 }
 0xfc9   :  { %v3155_v38 = vadd.f32 %v1733_v37, %v1725_v36 }
 0xfcb   :  { %2685 = vtanh.f32 %v3155_v38 }
 0xfd1   :  { %v2686_v39 = vpop.eup %2685 }
 0xfd2   :  { %1738 = vrot.lane.b32.xlu1 %v2686_v39, %s2850_s17 }
 0xfe1   :  { %v1755_v41 = vpop.permute.xlu0 %1754 }
 0xfe2   :  { %v3160_v42 = vadd.f32 %v1755_v41, %v1747_v40 }
 0xfe4   :  { %2687 = vtanh.f32 %v3160_v42 }
 0xfea   :  { %v2688_v43 = vpop.eup %2687 }
 0xfeb   :  { %1760 = vrot.lane.b32.xlu2 %v2688_v43, %s2850_s17 }
0x1044   :  { %v1739_v45 = vpop.permute.xlu1 %1738 }
0x1045   :  { %v1761_v26 = vpop.permute.xlu2 %1760  ;;  %v3164_v46 = vmul.f32 %v1739_v45, %v1724_v28  ;;  %v1930_v28 = vld [vmem:[#allocation2 + $0x7] sm:$0x1] }
0x1046   :  { %v3166_v47 = vmul.f32 %v1761_v26, %v1746_v14  ;;  %v1933_v14 = vld [vmem:[#allocation3] sm:$0x1]  ;;  %v1931_v34 = vunpack.c.l.bf16 %v1930_v28 }
0x1047   :  { %1843 = vrot.lane.b32.xlu0 %v3164_v46, %s2863_s4  ;;  %v1934_v35 = vunpack.c.l.bf16 %v1933_v14  ;;  %v2577_v14 = vld [vmem:[#allocation13] sm:$0xff] }
0x1048   :  { %1847 = vrot.lane.b32.xlu1 %v3166_v47, %s2850_s17  ;;  %v1804_v29 = vpack.c.bf16 %v3166_v47, %v3166_v47  ;;  %v1587_v47 = vpack.c.bf16 %v3135_v32, %v3135_v32 }
0x1050   :  { %462 = vrot.lane.b32.xlu1 %v456_v9, %s2863_s4 }
0x1058   :  { %721 = vrot.lane.b32.xlu1 %v715_v19, %s2863_s4 }
0x1060   :  { %900 = vrot.lane.b32.xlu1 %v894_v51, %s2863_s4  ;;  %v1548_v51 = vpack.c.bf16 %v3133_v31, %v3133_v31 }
0x1068   :  { %1159 = vrot.lane.b32.xlu1 %v1153_v20, %s2863_s4  ;;  %v2554_v20 = vld [vmem:[#allocation13 + $0x8] sm:$0xff] }
0x10b9   :  { %v1844_v24 = vpop.permute.xlu0 %1843 }
0x10ba   :  { %v1848_v48 = vpop.permute.xlu1 %1847 }
0x10bb   :  { %v1850_v27 = vsel %vm179_vm0, %v1844_v24, %v1848_v48 }
0x10bc   :  { %v1851_v0 = vpack.c.bf16 %v1850_v27, %v1850_v27 }
0x10be   :  { %2495 = vmatmul.msk.bf16.vlgmr.msrb.gmra.mxu2 %vm374_vm4, %v1851_v0  ;;  %2496 = vmatmul.msk.bf16.vlgmr.msrb.gmra.mxu3 %vm374_vm4, %v1851_v0  ;;  %v2564_v0 = vld [vmem:[#allocation12 + $0x8] sm:$0xff] }
0x10c2   :  { %v463_v30 = vpop.permute.xlu1 %462 }
0x10c3   :  { %2141 = vmatmul.msk.bf16.vlgmr.msrb.gmra.mxu0 %vm179_vm0, %v463_v30  ;;  %v2563_v30 = vld [vmem:[#allocation12] sm:$0xff] }
0x10c4   :  { %923 = vmatpush.bf16.msrb.mxu0 %v2552_v57  ;;  %v2600_v57 = vld [vmem:[#allocation12 + $0x8] sm:$0xff] }
0x10c8   :  { %924 = vmatpush.bf16.msrb.mxu0 %v2551_v13 }
0x10ca   :  { %v722_v16 = vpop.permute.xlu1 %721 }
0x10d2   :  { %v901_v19 = vpop.permute.xlu1 %900 }
0x10da   :  { %v1160_v28 = vpop.permute.xlu1 %1159 }
0x1140   :  { %v488_v33 = vpop.f32.mrf.mxu0 }
0x1141   :  { %v492_v36 = vadd.f32 %v488_v33, %v455_v12  ;;  %v1912_v37 = vpop.f32.mrf.mxu2  ;;  %v1925_v39 = vpop.f32.mrf.mxu3  ;;  %v2576_v12 = vld [vmem:[#allocation12 + $0x8] sm:$0xff]  ;;  %v2575_v33 = vld [vmem:[#allocation12] sm:$0xff] }
0x1142   :  { %v1932_v40 = vadd.f32 %v1931_v34, %v1912_v37  ;;  %v1935_v41 = vadd.f32 %v1934_v35, %v1925_v39  ;;  %v495_v34 = vld [vmem:[#allocation4 + $0xe] sm:$0x3] }
0x1143   :  { %493 = vst [vmem:[#allocation4] sm:$0x3] %v492_v36 }
0x1144   :  { %v1936_v43 = vmul.f32 %v1932_v40, %v2958_v4  ;;  %v1958_v45 = vmul.f32 %v1935_v41, %v2958_v4  ;;  %v496_v4 = vpack.c.bf16 %v2982_v53, %v2982_v53  ;;  %v714_v41 = vld [vmem:[#allocation4 + $0xc] sm:$0x3] }
0x1146   :  { %2689 = vtanh.f32 %v1936_v43  ;;  %v2588_v43 = vld [vmem:[#allocation12 + $0x8] sm:$0xff] }
0x1147   :  { %2691 = vtanh.f32 %v1958_v45 }
0x1148   :  { %v490_v26 = vpop.f32.mrf.mxu0 }
0x1149   :  { %v1914_v22 = vpop.f32.mrf.mxu2  ;;  %v1927_v50 = vpop.f32.mrf.mxu3 }
0x114c   :  { %v2690_v54 = vpop.eup %2689 }
0x114d   :  { %v2692_v55 = vpop.eup %2691  ;;  %v1938_v44 = vadd.f32 1.0, %v2690_v54 }
0x114e   :  { %v1960_v59 = vadd.f32 1.0, %v2692_v55 }
0x114f   :  { %v1939_v60 = vmul.f32 0.5, %v1938_v44 }
0x1150   :  { %v1961_v62 = vmul.f32 0.5, %v1960_v59 }
0x1151   :  { %v3195_v63 = vsel %vm2949_vm3, %v2690_v54, %v1939_v60  ;;  %v2587_v54 = vld [vmem:[#allocation12] sm:$0xff] }
0x1152   :  { %v3199_v52 = vsel %vm2949_vm3, %v2692_v55, %v1961_v62  ;;  %1943 = vrot.lane.b32.xlu2 %v3195_v63, %s2850_s17  ;;  %v1941_v31 = vmul.f32 %v3195_v63, %v3155_v38  ;;  %v2578_v38 = vld [vmem:[#allocation13 + $0x8] sm:$0xff]  ;;  %v674_v55 = vld [vmem:[#allocation4 + $0x2] sm:$0x3] }
0x1153   :  { %1965 = vrot.lane.b32.xlu0 %v3199_v52, %s2850_s17  ;;  %v1963_v36 = vmul.f32 %v3199_v52, %v3160_v42  ;;  %v1765_v42 = vpack.c.bf16 %v3164_v46, %v3164_v46  ;;  %v2590_v46 = vld [vmem:[#allocation13 + $0x8] sm:$0xff] }
0x115a   :  { %502 = vrot.lane.b32.xlu2 %v496_v4, %s2863_s4 }
0x115b   :  { %681 = vrot.lane.b32.xlu0 %v675_v2, %s2863_s4 }
0x11ac   :  { %v1944_v53 = vpop.permute.xlu2 %1943 }
0x11ad   :  { %v1946_v9 = vmul.f32 %v1944_v53, %v3195_v63  ;;  %v2602_v53 = vld [vmem:[#allocation13 + $0x8] sm:$0xff] }
0x11af   :  { %1948 = vrot.lane.b32.xlu2 %v1946_v9, %s2863_s4  ;;  %v2601_v9 = vld [vmem:[#allocation13] sm:$0xff] }
0x11b4   :  { %v503_v10 = vpop.permute.xlu2 %502 }
0x11b5   :  { %2150 = vmatmul.msk.bf16.vlgmr.msrb.gmra.mxu1 %vm179_vm0, %v503_v10  ;;  %v2599_v10 = vld [vmem:[#allocation12] sm:$0xff] }
0x11b6   :  { %963 = vmatpush.bf16.msrb.mxu1 %v2554_v20 }
0x11b7   :  { %940 = vrot.lane.b32.xlu2 %v934_v11, %s2863_s4 }
0x11ba   :  { %964 = vmatpush.bf16.msrb.mxu1 %v2553_v21 }
0x11bf   :  { %1337 = vrot.lane.b32.xlu2 %v1331_v15, %s2863_s4 }
0x11c5   :  { %v1966_v56 = vpop.permute.xlu0 %1965  ;;  %2202 = vmatmul.msk.bf16.vlgmr.msra.gmra.mxu1 %vm179_vm0, %v722_v16 }
0x11c6   :  { %v1968_v49 = vmul.f32 %v1966_v56, %v3199_v52  ;;  %1182 = vmatpush.bf16.msra.mxu1 %v2566_v6  ;;  %v933_v56 = vld [vmem:[#allocation4 + $0xa] sm:$0x3] }
0x11c8   :  { %1970 = vrot.lane.b32.xlu0 %v1968_v49, %s2863_s4 }
0x11ca   :  { %1183 = vmatpush.bf16.msra.mxu1 %v2565_v23 }
0x11cd   :  { %v682_v1 = vpop.permute.xlu0 %681 }
0x11ce   :  { %2193 = vmatmul.msk.bf16.vlgmr.msra.gmra.mxu0 %vm179_vm0, %v682_v1 }
0x11cf   :  { %1142 = vmatpush.bf16.msra.mxu0 %v2564_v0 }
0x11d0   :  { %1119 = vrot.lane.b32.xlu0 %v1113_v18, %s2863_s4 }
0x11d3   :  { %1143 = vmatpush.bf16.msra.mxu0 %v2563_v30  ;;  %v2612_v30 = vld [vmem:[#allocation12 + $0x8] sm:$0xff] }
0x11d8   :  { %1376 = vrot.lane.b32.xlu0 %v1370_v17, %s2863_s4 }
0x11de   :  { %2245 = vmatmul.msk.bf16.vlgmr.msrb.gmra.mxu0 %vm179_vm0, %v901_v19  ;;  %v1152_v19 = vld [vmem:[#allocation4 + $0x8] sm:$0x3] }
0x11df   :  { %1360 = vmatpush.bf16.msrb.mxu0 %v2576_v12 }
0x11e0   :  { %1554 = vrot.lane.b32.xlu0 %v1548_v51, %s2863_s4 }
0x11e3   :  { %1361 = vmatpush.bf16.msrb.mxu0 %v2575_v33 }
0x11e8   :  { %1810 = vrot.lane.b32.xlu0 %v1804_v29, %s2863_s4 }
0x1209   :  { %v1949_v24 = vpop.permute.xlu2 %1948 }
0x120a   :  { %v1951_v48 = vadd.f32 %v1949_v24, %v1941_v31  ;;  %v1112_v31 = vld [vmem:[#allocation4 + $0x6] sm:$0x3] }
0x120c   :  { %2693 = vtanh.f32 %v1951_v48 }
0x1211   :  { %v941_v25 = vpop.permute.xlu2 %940 }
0x1212   :  { %v2694_v27 = vpop.eup %2693  ;;  %2254 = vmatmul.msk.bf16.vlgmr.msrb.gmra.mxu1 %vm179_vm0, %v941_v25 }
0x1213   :  { %1954 = vrot.lane.b32.xlu1 %v2694_v27, %s2850_s17  ;;  %1399 = vmatpush.bf16.msrb.mxu1 %v2578_v38  ;;  %v2613_v38 = vld [vmem:[#allocation13] sm:$0xff] }
0x1217   :  { %1400 = vmatpush.bf16.msrb.mxu1 %v2577_v14 }
0x1219   :  { %v1338_v4 = vpop.permute.xlu2 %1337 }
0x121b   :  { %1593 = vrot.lane.b32.xlu1 %v1587_v47, %s2863_s4 }
0x1222   :  { %2306 = vmatmul.msk.bf16.vlgmr.msra.gmra.mxu1 %vm179_vm0, %v1160_v28  ;;  %v2611_v28 = vld [vmem:[#allocation12] sm:$0xff] }
0x1223   :  { %1616 = vmatpush.bf16.msra.mxu1 %v2590_v46 }
0x1227   :  { %1617 = vmatpush.bf16.msra.mxu1 %v2589_v61 }
0x1232   :  { %v528_v35 = vpop.f32.mrf.mxu1 }
0x1233   :  { %v532_v32 = vadd.f32 %v528_v35, %v495_v34 }
0x1235   :  { %533 = vst [vmem:[#allocation4 + $0xe] sm:$0x3] %v532_v32 }
0x123a   :  { %v1971_v37 = vpop.permute.xlu0 %1970  ;;  %v530_v39 = vpop.f32.mrf.mxu1 }
0x123b   :  { %v1973_v40 = vadd.f32 %v1971_v37, %v1963_v36 }
0x123d   :  { %2695 = vtanh.f32 %v1973_v40 }
0x1242   :  { %v1120_v45 = vpop.permute.xlu0 %1119  ;;  %v747_v26 = vpop.f32.mrf.mxu1 }
0x1243   :  { %v2696_v22 = vpop.eup %2695  ;;  %v751_v50 = vadd.f32 %v747_v26, %v714_v41  ;;  %2297 = vmatmul.msk.bf16.vlgmr.msra.gmra.mxu0 %vm179_vm0, %v1120_v45 }
0x1244   :  { %1976 = vrot.lane.b32.xlu2 %v2696_v22, %s2850_s17  ;;  %1577 = vmatpush.bf16.msra.mxu0 %v2588_v43 }
0x1245   :  { %752 = vst [vmem:[#allocation4 + $0xc] sm:$0x3] %v751_v50 }
0x1248   :  { %1578 = vmatpush.bf16.msra.mxu0 %v2587_v54 }
0x124a   :  { %v1377_v44 = vpop.permute.xlu0 %1376  ;;  %v749_v59 = vpop.f32.mrf.mxu1 }
0x124b   :  { %v707_v60 = vpop.f32.mrf.mxu0  ;;  %2358 = vmatmul.msk.bf16.vlgmr.msrb.gmra.mxu1 %vm179_vm0, %v1377_v44 }
0x124c   :  { %v711_v62 = vadd.f32 %v707_v60, %v674_v55  ;;  %1771 = vrot.lane.b32.xlu2 %v1765_v42, %s2863_s4  ;;  %1833 = vmatpush.bf16.msrb.mxu1 %v2602_v53  ;;  %v2019_v53 = vld [vmem:[#allocation4] sm:$0x3] }
0x124e   :  { %712 = vst [vmem:[#allocation4 + $0x2] sm:$0x3] %v711_v62 }
0x1250   :  { %1834 = vmatpush.bf16.msrb.mxu1 %v2601_v9 }
0x1252   :  { %v1555_v7 = vpop.permute.xlu0 %1554 }
0x1253   :  { %v709_v2 = vpop.f32.mrf.mxu0  ;;  %2349 = vmatmul.msk.bf16.vlgmr.msrb.gmra.mxu0 %vm179_vm0, %v1338_v4  ;;  %v1764_v4 = vld [vmem:[#allocation4 + $0xc] sm:$0x3] }
0x1254   :  { %1794 = vmatpush.bf16.msrb.mxu0 %v2600_v57 }
0x1255   :  { %v1803_v44 = vld [vmem:[#allocation4 + $0x2] sm:$0x3] }
0x1258   :  { %1795 = vmatpush.bf16.msrb.mxu0 %v2599_v10 }
0x125a   :  { %v1811_v17 = vpop.permute.xlu0 %1810 }
0x125b   :  { %v926_v58 = vpop.f32.mrf.mxu0 }
0x125c   :  { %v930_v5 = vadd.f32 %v926_v58, %v893_v3 }
0x125e   :  { %931 = vst [vmem:[#allocation4 + $0x4] sm:$0x3] %v930_v5 }
0x1263   :  { %v928_v8 = vpop.f32.mrf.mxu0  ;;  %2401 = vmatmul.msk.bf16.vlgmr.msra.gmra.mxu0 %vm179_vm0, %v1555_v7 }
0x1264   :  { %2010 = vmatpush.bf16.msra.mxu0 %v2612_v30  ;;  %v1980_v8 = vld [vmem:[#allocation4 + $0xe] sm:$0x3] }
0x1265   :  { %v1586_v22 = vld [vmem:[#allocation4 + $0x4] sm:$0x3] }
0x1268   :  { %2011 = vmatpush.bf16.msra.mxu0 %v2611_v28 }
0x1285   :  { %v1955_v11 = vpop.permute.xlu1 %1954 }
0x1286   :  { %v1957_v13 = vmul.f32 %v1955_v11, %v3195_v63 }
0x1288   :  { %v1981_v15 = vpack.c.bf16 %v1957_v13, %v1957_v13 }
0x128a   :  { %1987 = vrot.lane.b32.xlu1 %v1981_v15, %s2863_s4 }
0x128d   :  { %v1594_v16 = vpop.permute.xlu1 %1593 }
0x128e   :  { %2410 = vmatmul.msk.bf16.vlgmr.msra.gmra.mxu1 %vm179_vm0, %v1594_v16 }
0x128f   :  { %v966_v49 = vpop.f32.mrf.mxu1 }
0x1290   :  { %v970_v1 = vadd.f32 %v966_v49, %v933_v56 }
0x1292   :  { %971 = vst [vmem:[#allocation4 + $0xa] sm:$0x3] %v970_v1 }
0x1297   :  { %v968_v18 = vpop.f32.mrf.mxu1 }
0x1299   :  { %v1547_v37 = vld [vmem:[#allocation4 + $0xa] sm:$0x3] }
0x129e   :  { %v1977_v51 = vpop.permute.xlu2 %1976  ;;  %2462 = vmatmul.msk.bf16.vlgmr.msrb.gmra.mxu1 %vm179_vm0, %v1811_v17 }
0x129f   :  { %v1979_v29 = vmul.f32 %v1977_v51, %v3199_v52  ;;  %v1185_v20 = vpop.f32.mrf.mxu1  ;;  %v2614_v52 = vld [vmem:[#allocation13 + $0x8] sm:$0xff] }
0x12a0   :  { %v1189_v63 = vadd.f32 %v1185_v20, %v1152_v19  ;;  %2049 = vmatpush.bf16.msra.mxu1 %v2614_v52 }
0x12a1   :  { %v2020_v21 = vpack.c.bf16 %v1979_v29, %v1979_v29 }
0x12a2   :  { %1190 = vst [vmem:[#allocation4 + $0x8] sm:$0x3] %v1189_v63 }
0x12a3   :  { %2026 = vrot.lane.b32.xlu2 %v2020_v21, %s2863_s4 }
0x12a4   :  { %2050 = vmatpush.bf16.msra.mxu1 %v2613_v38 }
0x12a6   :  { %v1772_v6 = vpop.permute.xlu2 %1771 }
0x12a7   :  { %2453 = vmatmul.msk.bf16.vlgmr.msrb.gmra.mxu0 %vm179_vm0, %v1772_v6  ;;  %v1187_v23 = vpop.f32.mrf.mxu1 }
0x12a9   :  { %v1330_v14 = vld [vmem:[#allocation4 + $0x8] sm:$0x3] }
0x12c0   :  { %v1145_v24 = vpop.f32.mrf.mxu0 }
0x12c1   :  { %v1149_v48 = vadd.f32 %v1145_v24, %v1112_v31 }
0x12c3   :  { %1150 = vst [vmem:[#allocation4 + $0x6] sm:$0x3] %v1149_v48 }
0x12c8   :  { %v1147_v25 = vpop.f32.mrf.mxu0  ;;  %v1402_v27 = vpop.f32.mrf.mxu1 }
0x12ca   :  { %v1369_v47 = vld [vmem:[#allocation4 + $0x6] sm:$0x3] }
0x12cb   :  { %v1406_v0 = vadd.f32 %v1402_v27, %v1369_v47 }
0x12cd   :  { %1407 = vst [vmem:[#allocation4 + $0x6] sm:$0x3] %v1406_v0 }
0x12d0   :  { %v1363_v12 = vpop.f32.mrf.mxu0  ;;  %v1404_v33 = vpop.f32.mrf.mxu1 }
0x12d1   :  { %v1367_v34 = vadd.f32 %v1363_v12, %v1330_v14 }
0x12d3   :  { %1368 = vst [vmem:[#allocation4 + $0x8] sm:$0x3] %v1367_v34 }
0x12d4   :  { %v2061_v35 = vld [vmem:[#allocation4 + $0x6] sm:$0x3] }
0x12d5   :  { %2070 = vst.msk [vmem:[%s3305_s9 + $0x6] sm:$0x3] %vm2066_vm5, %v2061_v35 }
0x12d8   :  { %v1365_v32 = vpop.f32.mrf.mxu0 }
0x12da   :  { %v2062_v36 = vld [vmem:[#allocation4 + $0x8] sm:$0x3] }
0x12db   :  { %2071 = vst.msk [vmem:[%s3305_s9 + $0x8] sm:$0x3] %vm2066_vm5, %v2062_v36 }
0x12e0   :  { %v1580_v39 = vpop.f32.mrf.mxu0 }
0x12e1   :  { %v1584_v40 = vadd.f32 %v1580_v39, %v1547_v37 }
0x12e3   :  { %1585 = vst [vmem:[#allocation4 + $0xa] sm:$0x3] %v1584_v40 }
0x12e8   :  { %v1582_v41 = vpop.f32.mrf.mxu0 }
0x12ea   :  { %v2063_v43 = vld [vmem:[#allocation4 + $0xa] sm:$0x3] }
0x12eb   :  { %2072 = vst.msk [vmem:[%s3305_s9 + $0xa] sm:$0x3] %vm2066_vm5, %v2063_v43 }
0x12fc   :  { %v1988_v45 = vpop.permute.xlu1 %1987 }
0x12fd   :  { %v2027_v26 = vpop.permute.xlu2 %2026  ;;  %2505 = vmatmul.msk.bf16.vlgmr.msra.gmra.mxu0 %vm179_vm0, %v1988_v45 }
0x12fe   :  { %2514 = vmatmul.msk.bf16.vlgmr.msra.gmra.mxu1 %vm179_vm0, %v2027_v26 }
0x130b   :  { %v1619_v50 = vpop.f32.mrf.mxu1 }
0x130c   :  { %v1623_v54 = vadd.f32 %v1619_v50, %v1586_v22 }
0x130e   :  { %1624 = vst [vmem:[#allocation4 + $0x4] sm:$0x3] %v1623_v54 }
0x1313   :  { %v1621_v55 = vpop.f32.mrf.mxu1 }
0x1315   :  { %v2060_v42 = vld [vmem:[#allocation4 + $0x4] sm:$0x3] }
0x1316   :  { %2069 = vst.msk [vmem:[%s3305_s9 + $0x4] sm:$0x3] %vm2066_vm5, %v2060_v42 }
0x131b   :  { %v1836_v59 = vpop.f32.mrf.mxu1 }
0x131c   :  { %v1840_v60 = vadd.f32 %v1836_v59, %v1803_v44 }
0x131e   :  { %1841 = vst [vmem:[#allocation4 + $0x2] sm:$0x3] %v1840_v60 }
0x1323   :  { %v1838_v62 = vpop.f32.mrf.mxu1 }
0x1324   :  { %v1797_v2 = vpop.f32.mrf.mxu0 }
0x1325   :  { %v2059_v3 = vld [vmem:[#allocation4 + $0x2] sm:$0x3]  ;;  %v1801_v58 = vadd.f32 %v1797_v2, %v1764_v4 }
0x1326   :  { %2068 = vst.msk [vmem:[%s3305_s9 + $0x2] sm:$0x3] %vm2066_vm5, %v2059_v3 }
0x1327   :  { %1802 = vst [vmem:[#allocation4 + $0xc] sm:$0x3] %v1801_v58 }
0x132c   :  { %v1799_v5 = vpop.f32.mrf.mxu0 }
0x132e   :  { %v2064_v7 = vld [vmem:[#allocation4 + $0xc] sm:$0x3] }
0x132f   :  { %2073 = vst.msk [vmem:[%s3305_s9 + $0xc] sm:$0x3] %vm2066_vm5, %v2064_v7 }
0x137a   :  { %v2013_v46 = vpop.f32.mrf.mxu0 }
0x137b   :  { %v2017_v61 = vadd.f32 %v2013_v46, %v1980_v8  ;;  %v2052_v9 = vpop.f32.mrf.mxu1 }
0x137c   :  { %v2056_v57 = vadd.f32 %v2052_v9, %v2019_v53 }
0x137d   :  { %2018 = vst [vmem:[#allocation4 + $0xe] sm:$0x3] %v2017_v61 }
0x137e   :  { %2057 = vst [vmem:[#allocation4] sm:$0x3] %v2056_v57 }
0x1382   :  { %v2015_v10 = vpop.f32.mrf.mxu0 }
0x1383   :  { %v2054_v11 = vpop.f32.mrf.mxu1 }
0x1384   :  { %v2065_v13 = vld [vmem:[#allocation4 + $0xe] sm:$0x3] }
0x1385   :  { %2074 = vst.msk [vmem:[%s3305_s9 + $0xe] sm:$0x3] %vm2066_vm5, %v2065_v13  ;;  %v2058_v15 = vld [vmem:[#allocation4] sm:$0x3] }
0x1386   :  { %2067 = vst.msk [vmem:[%s3305_s9] sm:$0x3] %vm2066_vm5, %v2058_v15 }
0x1387   :  { %2079 = vsyncpa [#allocation6], 1 }
0x1388   :  { %2080 = vsyncpa [#allocation8], 1 }
0x1389   :  { %2081 = vsyncpa [#allocation11], 1 }
0x138a   :  { %2082 = vsyncpa [#allocation14], 1 }

</bundles_post_ra>
